<compile_context>
chip_gen: v5e
topology: v5e:2x2
jax: 0.10.0
libtpu: 0.0.40
codegen_flags: <defaults>
</compile_context>

<pallas_src>
import math
from functools import partial

import jax
import jax.numpy as jnp
import numpy as np
from jax.experimental import pallas as pl
from jax.experimental.pallas import tpu as pltpu


def csar_kernel(x_ref, w1_ref, b1_ref, w2_ref, b2_ref,
                wc1_ref, bc1_ref, wc2_ref, bc2_ref,
                ws1_ref, bs1_ref, ws2_ref, bs2_ref,
                woa_ref, wob_ref, bo_ref,
                o_ref, pad_ref, *, H, W, lpad):
    """Entire CSAR block for one batch element.

    Layout: channels on the sublane axis, flattened spatial (H*W) on the lane axis.

    x_ref       : (1, C, H*W) f32 input tile
    w1/w2_ref   : (3, 3, C, C) bf16 3x3 conv weights, per-tap (Cout, Cin) tiles
    wc1/wc2_ref : (C//4, C) / (C, C//4) bf16 channel-attention weights (out, in)
    ws1/ws2_ref : (2C, C) / (C, 2C)     bf16 spatial-attention 1x1 weights (out, in)
    woa/wob_ref : (C, C) bf16 conv_out weight split over the channel concat
                  (woa -> CA branch, wob -> SA branch; split == concat)
    b*_ref      : (n, 1) f32 bias columns (broadcast over the lane axis)
    o_ref       : (1, C, H*W) output tile
    pad_ref     : (C, lpad + H*W + W + 1) f32 VMEM scratch: flat zero-padded image.
                  Interior [lpad, lpad+H*W) is rewritten before every conv at a
                  128-aligned lane offset; the zero borders make each 3x3 tap a
                  static contiguous lane slice (no im2col concat, no relayout-heavy
                  sub-lane slicing).
    """
    f32, bf16 = jnp.float32, jnp.bfloat16
    C = o_ref.shape[1]
    HW = H * W
    rpad = pad_ref.shape[1] - lpad - HW

    # Zero only the pad borders; the interior is fully rewritten by each conv.
    # Not gated on program_id: with a "parallel" batch grid each core owns its own
    # scratch, so every grid step re-establishes its own zero borders (tiny cost).
    pad_ref[:, 0:lpad] = jnp.zeros((C, lpad), f32)
    pad_ref[:, lpad + HW:lpad + HW + rpad] = jnp.zeros((C, rpad), f32)

    # Column-wrap masks, hoisted once and reused by both convs.  The flat zero pad
    # already handles row-out-of-range taps; only taps crossing a row boundary
    # (w==0 for dw==0, w==W-1 for dw==2) alias the neighbouring row and must be zeroed.
    w_idx = jax.lax.broadcasted_iota(jnp.int32, (C, HW), 1) % W
    mask_l = (w_idx > 0).astype(f32)
    mask_r = (w_idx < W - 1).astype(f32)

    def conv3x3(src_f32, w_ref, b_ref):
        # Interior write at a 128-aligned lane offset -> plain (unmasked) stores.
        pad_ref[:, lpad:lpad + HW] = src_f32
        acc = jnp.zeros((C, HW), f32)
        for dh in range(3):
            for dw in range(3):
                start = lpad + (dh - 1) * W + (dw - 1)        # static lane offset
                xt = pad_ref[:, start:start + HW]             # (C, HW) f32
                if dw == 0:
                    xt = xt * mask_l
                elif dw == 2:
                    xt = xt * mask_r
                # bf16 MXU operands, f32 accumulation.
                acc = acc + jnp.dot(w_ref[dh, dw], xt.astype(bf16),
                                    preferred_element_type=f32)
        return acc + b_ref[...]                               # (C, HW) f32

    x = x_ref[0].astype(f32)                                  # (C, HW)

    # conv_in: Conv3x3 -> ReLU -> Conv3x3
    y1 = jnp.maximum(conv3x3(x, w1_ref, b1_ref), 0.0)
    x_in = conv3x3(y1, w2_ref, b2_ref)                        # (C, HW)
    x_in_bf = x_in.astype(bf16)

    # Channel attention: global avg pool -> Linear -> ReLU -> Linear -> sigmoid.
    m = jnp.mean(x_in, axis=1, keepdims=True)                 # (C, 1)
    h = jnp.maximum(
        jnp.dot(wc1_ref[...], m.astype(bf16), preferred_element_type=f32)
        + bc1_ref[...], 0.0)                                  # (C//4, 1)
    g_ca = jax.nn.sigmoid(
        jnp.dot(wc2_ref[...], h.astype(bf16), preferred_element_type=f32)
        + bc2_ref[...])                                       # (C, 1) gate

    # Spatial attention: 1x1 conv -> ReLU -> 1x1 conv -> sigmoid.
    s1 = jnp.maximum(
        jnp.dot(ws1_ref[...], x_in_bf, preferred_element_type=f32)
        + bs1_ref[...], 0.0)                                  # (2C, HW)
    g_sa = jax.nn.sigmoid(
        jnp.dot(ws2_ref[...], s1.astype(bf16), preferred_element_type=f32)
        + bs2_ref[...])                                       # (C, HW) gate

    # Channel-concat branches; conv_out (1x1) as a split-weight sum (no concat).
    br_ca = x_in * x_in * g_ca                                # = x_in * (x_in * g_ca)
    br_sa = x_in * g_sa
    out = (jnp.dot(woa_ref[...], br_ca.astype(bf16), preferred_element_type=f32)
           + jnp.dot(wob_ref[...], br_sa.astype(bf16), preferred_element_type=f32)
           + bo_ref[...])                                     # (C, HW)

    # Residual add; lane-dense (C, H*W) store.
    o_ref[0] = (x + out).astype(o_ref.dtype)


def csar_forward(x_nchw, params):
    """CSAR.forward: NCHW in/out; spatial is flattened so the lane axis is H*W."""
    (w1, b1, w2, b2, wc1, bc1, wc2, bc2, ws1, bs1, ws2, bs2, wo, bo) = params
    B, C, H, W = x_nchw.shape
    HW = H * W
    C4 = wc1.shape[0]
    lpad = ((W + 1 + 127) // 128) * 128      # 128-aligned left zero pad >= W+1
    rpad = W + 1
    pad_len = lpad + HW + rpad

    x_flat = x_nchw.reshape(B, C, HW)        # contiguous reshape, no HBM transpose

    bf = lambda a: a.astype(jnp.bfloat16)
    taps = lambda w: bf(jnp.transpose(w, (2, 3, 0, 1)))    # OIHW -> (kh, kw, O, I)
    col = lambda v: v.reshape(-1, 1).astype(jnp.float32)   # bias -> (n, 1) column

    c2 = lambda s: pl.BlockSpec(s, lambda b: (0, 0))
    c4 = lambda s: pl.BlockSpec(s, lambda b: (0, 0, 0, 0))

    kernel = partial(csar_kernel, H=H, W=W, lpad=lpad)

    out_flat = pl.pallas_call(
        kernel,
        out_shape=jax.ShapeDtypeStruct((B, C, HW), x_nchw.dtype),
        grid=(B,),
        in_specs=[
            pl.BlockSpec((1, C, HW), lambda b: (b, 0, 0)),     # x (lane-dense)
            c4((3, 3, C, C)), c2((C, 1)),                      # conv1 w, b
            c4((3, 3, C, C)), c2((C, 1)),                      # conv2 w, b
            c2((C4, C)), c2((C4, 1)),                          # CA fc1 w, b
            c2((C, C4)), c2((C, 1)),                           # CA fc2 w, b
            c2((2 * C, C)), c2((2 * C, 1)),                    # SA conv1 w, b
            c2((C, 2 * C)), c2((C, 1)),                        # SA conv2 w, b
            c2((C, C)), c2((C, C)), c2((C, 1)),                # conv_out w_ca, w_sa, b
        ],
        out_specs=pl.BlockSpec((1, C, HW), lambda b: (b, 0, 0)),
        scratch_shapes=[pltpu.VMEM((C, pad_len), jnp.float32)],
        compiler_params=pltpu.CompilerParams(
            dimension_semantics=("parallel",)),    # batch grid -> both TCs on v7x
    )(x_flat,
      taps(w1), col(b1), taps(w2), col(b2),
      bf(wc1), col(bc1), bf(wc2), col(bc2),
      bf(ws1), col(bs1), bf(ws2), col(bs2),
      bf(wo[:, :C]), bf(wo[:, C:]), col(bo))
    return out_flat.reshape(B, C, H, W)


def init_params(key, C):
    """Deterministic params in PyTorch-native layouts (OIHW convs, (out,in) linears)."""
    C4 = max(C // 4, 1)
    ks = jax.random.split(key, 14)

    def u(k, shape, fan_in):
        bound = 1.0 / math.sqrt(fan_in)
        return jax.random.uniform(k, shape, jnp.float32, -bound, bound)

    w1 = u(ks[0], (C, C, 3, 3), C * 9)       # OIHW
    b1 = u(ks[1], (C,), C * 9)
    w2 = u(ks[2], (C, C, 3, 3), C * 9)
    b2 = u(ks[3], (C,), C * 9)
    wc1 = u(ks[4], (C4, C), C)               # Linear (out, in)
    bc1 = u(ks[5], (C4,), C)
    wc2 = u(ks[6], (C, C4), C4)
    bc2 = u(ks[7], (C,), C4)
    ws1 = u(ks[8], (2 * C, C), C)            # 1x1 conv (out, in)
    bs1 = u(ks[9], (2 * C,), C)
    ws2 = u(ks[10], (C, 2 * C), 2 * C)
    bs2 = u(ks[11], (C,), 2 * C)
    wo = u(ks[12], (C, 2 * C), 2 * C)        # conv_out 1x1 (out, in=2C)
    bo = u(ks[13], (C,), 2 * C)
    return (w1, b1, w2, b2, wc1, bc1, wc2, bc2, ws1, bs1, ws2, bs2, wo, bo)


def _reference_forward(x, params):
    """Pure-JAX (lax/XLA) f32 reference of CSAR.forward in NCHW."""
    (w1, b1, w2, b2, wc1, bc1, wc2, bc2, ws1, bs1, ws2, bs2, wo, bo) = params

    def conv3(v, w_oihw, b):
        y = jax.lax.conv_general_dilated(
            v, w_oihw, window_strides=(1, 1), padding="SAME",
            dimension_numbers=("NCHW", "OIHW", "NCHW"))
        return y + b[None, :, None, None]

    y1 = jnp.maximum(conv3(x, w1, b1), 0.0)
    x_in = conv3(y1, w2, b2)

    m = jnp.mean(x_in, axis=(2, 3))                                   # (B, C)
    h = jnp.maximum(m @ wc1.T + bc1[None, :], 0.0)
    g_ca = jax.nn.sigmoid(h @ wc2.T + bc2[None, :])[:, :, None, None]

    s1 = jnp.maximum(jnp.einsum("bchw,dc->bdhw", x_in, ws1)
                     + bs1[None, :, None, None], 0.0)
    g_sa = jax.nn.sigmoid(jnp.einsum("bdhw,cd->bchw", s1, ws2)
                          + bs2[None, :, None, None])

    cat = jnp.concatenate([x_in * (x_in * g_ca), x_in * g_sa], axis=1)  # (B, 2C, H, W)
    out = jnp.einsum("bkhw,ck->bchw", cat, wo) + bo[None, :, None, None]
    return x + out


if __name__ == "__main__":
    key = jax.random.PRNGKey(0)
    B, C, H, W = 2, 4, 16, 16

    kx, kp = jax.random.split(key)
    x = jax.random.normal(kx, (B, C, H, W), jnp.float32)
    params = init_params(kp, C)

    fwd = jax.jit(csar_forward)
    out = jax.block_until_ready(fwd(x, params))
    assert out.shape == (B, C, H, W), out.shape

    ref = jax.block_until_ready(_reference_forward(x, params))
    # Tolerance relaxed vs. the f32 reference because the kernel uses bf16 MXU
    # operands (f32 accumulation), per the v6e/v7x performance guidance.
    np.testing.assert_allclose(np.asarray(out), np.asarray(ref),
                               rtol=3e-2, atol=3e-2)

    print("KERNEL_OK")
</pallas_src>

<mosaic_0001>
module attributes {stable_mosaic.version = 11 : i64} {
  func.func @csar_kernel(%arg0: i32, %arg1: memref<1x4x256xf32, #tpu.memory_space<vmem>>, %arg2: memref<3x3x4x4xbf16, #tpu.memory_space<vmem>>, %arg3: memref<4x1xf32, #tpu.memory_space<vmem>>, %arg4: memref<3x3x4x4xbf16, #tpu.memory_space<vmem>>, %arg5: memref<4x1xf32, #tpu.memory_space<vmem>>, %arg6: memref<1x4xbf16, #tpu.memory_space<vmem>>, %arg7: memref<1x1xf32, #tpu.memory_space<vmem>>, %arg8: memref<4x1xbf16, #tpu.memory_space<vmem>>, %arg9: memref<4x1xf32, #tpu.memory_space<vmem>>, %arg10: memref<8x4xbf16, #tpu.memory_space<vmem>>, %arg11: memref<8x1xf32, #tpu.memory_space<vmem>>, %arg12: memref<4x8xbf16, #tpu.memory_space<vmem>>, %arg13: memref<4x1xf32, #tpu.memory_space<vmem>>, %arg14: memref<4x4xbf16, #tpu.memory_space<vmem>>, %arg15: memref<4x4xbf16, #tpu.memory_space<vmem>>, %arg16: memref<4x1xf32, #tpu.memory_space<vmem>>, %arg17: memref<1x4x256xf32, #tpu.memory_space<vmem>>, %arg18: memref<4x401xf32, #tpu.memory_space<vmem>>) attributes {dimension_semantics = [#tpu.dimension_semantics<parallel>], iteration_bounds = array<i64: 2>, scalar_prefetch = 0 : i64, scratch_operands = 1 : i64, tpu.core_type = #tpu.core_type<tc>, window_params = [{transform_indices = @transform_0, window_bounds = array<i64: 1, 4, 256>}, {pipeline_mode = #tpu.pipeline_mode<synchronous>, transform_indices = @transform_1, window_bounds = array<i64: 3, 3, 4, 4>}, {pipeline_mode = #tpu.pipeline_mode<synchronous>, transform_indices = @transform_2, window_bounds = array<i64: 4, 1>}, {pipeline_mode = #tpu.pipeline_mode<synchronous>, transform_indices = @transform_3, window_bounds = array<i64: 3, 3, 4, 4>}, {pipeline_mode = #tpu.pipeline_mode<synchronous>, transform_indices = @transform_4, window_bounds = array<i64: 4, 1>}, {pipeline_mode = #tpu.pipeline_mode<synchronous>, transform_indices = @transform_5, window_bounds = array<i64: 1, 4>}, {pipeline_mode = #tpu.pipeline_mode<synchronous>, transform_indices = @transform_6, window_bounds = array<i64: 1, 1>}, {pipeline_mode = #tpu.pipeline_mode<synchronous>, transform_indices = @transform_7, window_bounds = array<i64: 4, 1>}, {pipeline_mode = #tpu.pipeline_mode<synchronous>, transform_indices = @transform_8, window_bounds = array<i64: 4, 1>}, {pipeline_mode = #tpu.pipeline_mode<synchronous>, transform_indices = @transform_9, window_bounds = array<i64: 8, 4>}, {pipeline_mode = #tpu.pipeline_mode<synchronous>, transform_indices = @transform_10, window_bounds = array<i64: 8, 1>}, {pipeline_mode = #tpu.pipeline_mode<synchronous>, transform_indices = @transform_11, window_bounds = array<i64: 4, 8>}, {pipeline_mode = #tpu.pipeline_mode<synchronous>, transform_indices = @transform_12, window_bounds = array<i64: 4, 1>}, {pipeline_mode = #tpu.pipeline_mode<synchronous>, transform_indices = @transform_13, window_bounds = array<i64: 4, 4>}, {pipeline_mode = #tpu.pipeline_mode<synchronous>, transform_indices = @transform_14, window_bounds = array<i64: 4, 4>}, {pipeline_mode = #tpu.pipeline_mode<synchronous>, transform_indices = @transform_15, window_bounds = array<i64: 4, 1>}, {transform_indices = @transform_16, window_bounds = array<i64: 1, 4, 256>}]} {
    %cst = arith.constant 0.000000e+00 : f32
    %0 = vector.broadcast %cst : f32 to vector<4x128xf32>
    %c0 = arith.constant 0 : index
    %c0_0 = arith.constant 0 : index
    %1 = vector.load %arg18[%c0, %c0_0] : memref<4x401xf32, #tpu.memory_space<vmem>>, vector<4x128xf32>
    tpu.vector_store %arg18[%c0, %c0_0], %0 {strides = array<i32>} : memref<4x401xf32, #tpu.memory_space<vmem>>, vector<4x128xf32>,
    %cst_1 = arith.constant 0.000000e+00 : f32
    %2 = vector.broadcast %cst_1 : f32 to vector<4x17xf32>
    %c0_2 = arith.constant 0 : index
    %c384 = arith.constant 384 : index
    %3 = vector.load %arg18[%c0_2, %c384] : memref<4x401xf32, #tpu.memory_space<vmem>>, vector<4x17xf32>
    tpu.vector_store %arg18[%c0_2, %c384], %2 {strides = array<i32>} : memref<4x401xf32, #tpu.memory_space<vmem>>, vector<4x17xf32>,
    %4 = tpu.iota {dimensions = array<i32: 1>} : vector<4x256xi32>
    %c16_i32 = arith.constant 16 : i32
    %c0_i32 = arith.constant 0 : i32
    %5 = arith.cmpi eq, %c16_i32, %c0_i32 : i32
    %c1_i32 = arith.constant 1 : i32
    %6 = arith.select %5, %c1_i32, %c16_i32 : i32
    %7 = vector.broadcast %6 : i32 to vector<4x256xi32>
    %8 = arith.remsi %4, %7 : vector<4x256xi32>
    %c0_i32_3 = arith.constant 0 : i32
    %9 = vector.broadcast %c0_i32_3 : i32 to vector<4x256xi32>
    %10 = arith.cmpi ne, %8, %9 : vector<4x256xi32>
    %c0_i32_4 = arith.constant 0 : i32
    %11 = vector.broadcast %c0_i32_4 : i32 to vector<4x256xi32>
    %12 = arith.cmpi slt, %8, %11 : vector<4x256xi32>
    %c0_i32_5 = arith.constant 0 : i32
    %13 = arith.cmpi slt, %6, %c0_i32_5 : i32
    %14 = vector.broadcast %13 : i1 to vector<4x256xi1>
    %15 = vector.broadcast %14 : vector<4x256xi1> to vector<4x256xi1>
    %16 = arith.xori %12, %15 : vector<4x256xi1>
    %17 = arith.andi %16, %10 : vector<4x256xi1>
    %18 = vector.broadcast %6 : i32 to vector<4x256xi32>
    %19 = arith.addi %8, %18 : vector<4x256xi32>
    %20 = arith.select %17, %19, %8 : vector<4x256xi1>, vector<4x256xi32>
    %c0_i32_6 = arith.constant 0 : i32
    %21 = vector.broadcast %c0_i32_6 : i32 to vector<4x256xi32>
    %22 = arith.cmpi sgt, %20, %21 : vector<4x256xi32>
    %23 = arith.extui %22 : vector<4x256xi1> to vector<4x256xi32>
    %24 = arith.sitofp %23 : vector<4x256xi32> to vector<4x256xf32>
    %c15_i32 = arith.constant 15 : i32
    %25 = vector.broadcast %c15_i32 : i32 to vector<4x256xi32>
    %26 = arith.cmpi slt, %20, %25 : vector<4x256xi32>
    %27 = arith.extui %26 : vector<4x256xi1> to vector<4x256xi32>
    %28 = arith.sitofp %27 : vector<4x256xi32> to vector<4x256xf32>
    %c0_7 = arith.constant 0 : index
    %c0_8 = arith.constant 0 : index
    %c0_9 = arith.constant 0 : index
    %29 = vector.load %arg1[%c0_7, %c0_8, %c0_9] : memref<1x4x256xf32, #tpu.memory_space<vmem>>, vector<1x4x256xf32>
    %30 = vector.shape_cast %29 : vector<1x4x256xf32> to vector<4x256xf32>
    %c0_10 = arith.constant 0 : index
    %c128 = arith.constant 128 : index
    %31 = vector.load %arg18[%c0_10, %c128] : memref<4x401xf32, #tpu.memory_space<vmem>>, vector<4x256xf32>
    tpu.vector_store %arg18[%c0_10, %c128], %30 {strides = array<i32>} : memref<4x401xf32, #tpu.memory_space<vmem>>, vector<4x256xf32>,
    %cst_11 = arith.constant 0.000000e+00 : f32
    %32 = vector.broadcast %cst_11 : f32 to vector<4x256xf32>
    %c0_12 = arith.constant 0 : index
    %c111 = arith.constant 111 : index
    %33 = vector.load %arg18[%c0_12, %c111] : memref<4x401xf32, #tpu.memory_space<vmem>>, vector<4x256xf32>
    %34 = arith.mulf %33, %24 : vector<4x256xf32>
    %c0_13 = arith.constant 0 : index
    %c0_14 = arith.constant 0 : index
    %c0_15 = arith.constant 0 : index
    %c0_16 = arith.constant 0 : index
    %35 = vector.load %arg2[%c0_13, %c0_14, %c0_15, %c0_16] : memref<3x3x4x4xbf16, #tpu.memory_space<vmem>>, vector<1x1x4x4xbf16>
    %36 = vector.shape_cast %35 : vector<1x1x4x4xbf16> to vector<4x4xbf16>
    %37 = arith.truncf %34 : vector<4x256xf32> to vector<4x256xbf16>
    %cst_17 = arith.constant dense<0.000000e+00> : vector<4x256xf32>
    %38 = tpu.matmul %36, %37, %cst_17 {dimension_numbers = #tpu.dot_dimension_numbers<[1], [0], [0], [1], [0, 0, 1, 1], [], []>} : vector<4x4xbf16>, vector<4x256xbf16>, vector<4x256xf32> -> vector<4x256xf32>
    %39 = arith.addf %32, %38 : vector<4x256xf32>
    %c0_18 = arith.constant 0 : index
    %c112 = arith.constant 112 : index
    %40 = vector.load %arg18[%c0_18, %c112] : memref<4x401xf32, #tpu.memory_space<vmem>>, vector<4x256xf32>
    %c0_19 = arith.constant 0 : index
    %c1 = arith.constant 1 : index
    %c0_20 = arith.constant 0 : index
    %c0_21 = arith.constant 0 : index
    %41 = vector.load %arg2[%c0_19, %c1, %c0_20, %c0_21] : memref<3x3x4x4xbf16, #tpu.memory_space<vmem>>, vector<1x1x4x4xbf16>
    %42 = vector.shape_cast %41 : vector<1x1x4x4xbf16> to vector<4x4xbf16>
    %43 = arith.truncf %40 : vector<4x256xf32> to vector<4x256xbf16>
    %cst_22 = arith.constant dense<0.000000e+00> : vector<4x256xf32>
    %44 = tpu.matmul %42, %43, %cst_22 {dimension_numbers = #tpu.dot_dimension_numbers<[1], [0], [0], [1], [0, 0, 1, 1], [], []>} : vector<4x4xbf16>, vector<4x256xbf16>, vector<4x256xf32> -> vector<4x256xf32>
    %45 = arith.addf %39, %44 : vector<4x256xf32>
    %c0_23 = arith.constant 0 : index
    %c113 = arith.constant 113 : index
    %46 = vector.load %arg18[%c0_23, %c113] : memref<4x401xf32, #tpu.memory_space<vmem>>, vector<4x256xf32>
    %47 = arith.mulf %46, %28 : vector<4x256xf32>
    %c0_24 = arith.constant 0 : index
    %c2 = arith.constant 2 : index
    %c0_25 = arith.constant 0 : index
    %c0_26 = arith.constant 0 : index
    %48 = vector.load %arg2[%c0_24, %c2, %c0_25, %c0_26] : memref<3x3x4x4xbf16, #tpu.memory_space<vmem>>, vector<1x1x4x4xbf16>
    %49 = vector.shape_cast %48 : vector<1x1x4x4xbf16> to vector<4x4xbf16>
    %50 = arith.truncf %47 : vector<4x256xf32> to vector<4x256xbf16>
    %cst_27 = arith.constant dense<0.000000e+00> : vector<4x256xf32>
    %51 = tpu.matmul %49, %50, %cst_27 {dimension_numbers = #tpu.dot_dimension_numbers<[1], [0], [0], [1], [0, 0, 1, 1], [], []>} : vector<4x4xbf16>, vector<4x256xbf16>, vector<4x256xf32> -> vector<4x256xf32>
    %52 = arith.addf %45, %51 : vector<4x256xf32>
    %c0_28 = arith.constant 0 : index
    %c127 = arith.constant 127 : index
    %53 = vector.load %arg18[%c0_28, %c127] : memref<4x401xf32, #tpu.memory_space<vmem>>, vector<4x256xf32>
    %54 = arith.mulf %53, %24 : vector<4x256xf32>
    %c1_29 = arith.constant 1 : index
    %c0_30 = arith.constant 0 : index
    %c0_31 = arith.constant 0 : index
    %c0_32 = arith.constant 0 : index
    %55 = vector.load %arg2[%c1_29, %c0_30, %c0_31, %c0_32] : memref<3x3x4x4xbf16, #tpu.memory_space<vmem>>, vector<1x1x4x4xbf16>
    %56 = vector.shape_cast %55 : vector<1x1x4x4xbf16> to vector<4x4xbf16>
    %57 = arith.truncf %54 : vector<4x256xf32> to vector<4x256xbf16>
    %cst_33 = arith.constant dense<0.000000e+00> : vector<4x256xf32>
    %58 = tpu.matmul %56, %57, %cst_33 {dimension_numbers = #tpu.dot_dimension_numbers<[1], [0], [0], [1], [0, 0, 1, 1], [], []>} : vector<4x4xbf16>, vector<4x256xbf16>, vector<4x256xf32> -> vector<4x256xf32>
    %59 = arith.addf %52, %58 : vector<4x256xf32>
    %c0_34 = arith.constant 0 : index
    %c128_35 = arith.constant 128 : index
    %60 = vector.load %arg18[%c0_34, %c128_35] : memref<4x401xf32, #tpu.memory_space<vmem>>, vector<4x256xf32>
    %c1_36 = arith.constant 1 : index
    %c1_37 = arith.constant 1 : index
    %c0_38 = arith.constant 0 : index
    %c0_39 = arith.constant 0 : index
    %61 = vector.load %arg2[%c1_36, %c1_37, %c0_38, %c0_39] : memref<3x3x4x4xbf16, #tpu.memory_space<vmem>>, vector<1x1x4x4xbf16>
    %62 = vector.shape_cast %61 : vector<1x1x4x4xbf16> to vector<4x4xbf16>
    %63 = arith.truncf %60 : vector<4x256xf32> to vector<4x256xbf16>
    %cst_40 = arith.constant dense<0.000000e+00> : vector<4x256xf32>
    %64 = tpu.matmul %62, %63, %cst_40 {dimension_numbers = #tpu.dot_dimension_numbers<[1], [0], [0], [1], [0, 0, 1, 1], [], []>} : vector<4x4xbf16>, vector<4x256xbf16>, vector<4x256xf32> -> vector<4x256xf32>
    %65 = arith.addf %59, %64 : vector<4x256xf32>
    %c0_41 = arith.constant 0 : index
    %c129 = arith.constant 129 : index
    %66 = vector.load %arg18[%c0_41, %c129] : memref<4x401xf32, #tpu.memory_space<vmem>>, vector<4x256xf32>
    %67 = arith.mulf %66, %28 : vector<4x256xf32>
    %c1_42 = arith.constant 1 : index
    %c2_43 = arith.constant 2 : index
    %c0_44 = arith.constant 0 : index
    %c0_45 = arith.constant 0 : index
    %68 = vector.load %arg2[%c1_42, %c2_43, %c0_44, %c0_45] : memref<3x3x4x4xbf16, #tpu.memory_space<vmem>>, vector<1x1x4x4xbf16>
    %69 = vector.shape_cast %68 : vector<1x1x4x4xbf16> to vector<4x4xbf16>
    %70 = arith.truncf %67 : vector<4x256xf32> to vector<4x256xbf16>
    %cst_46 = arith.constant dense<0.000000e+00> : vector<4x256xf32>
    %71 = tpu.matmul %69, %70, %cst_46 {dimension_numbers = #tpu.dot_dimension_numbers<[1], [0], [0], [1], [0, 0, 1, 1], [], []>} : vector<4x4xbf16>, vector<4x256xbf16>, vector<4x256xf32> -> vector<4x256xf32>
    %72 = arith.addf %65, %71 : vector<4x256xf32>
    %c0_47 = arith.constant 0 : index
    %c143 = arith.constant 143 : index
    %73 = vector.load %arg18[%c0_47, %c143] : memref<4x401xf32, #tpu.memory_space<vmem>>, vector<4x256xf32>
    %74 = arith.mulf %73, %24 : vector<4x256xf32>
    %c2_48 = arith.constant 2 : index
    %c0_49 = arith.constant 0 : index
    %c0_50 = arith.constant 0 : index
    %c0_51 = arith.constant 0 : index
    %75 = vector.load %arg2[%c2_48, %c0_49, %c0_50, %c0_51] : memref<3x3x4x4xbf16, #tpu.memory_space<vmem>>, vector<1x1x4x4xbf16>
    %76 = vector.shape_cast %75 : vector<1x1x4x4xbf16> to vector<4x4xbf16>
    %77 = arith.truncf %74 : vector<4x256xf32> to vector<4x256xbf16>
    %cst_52 = arith.constant dense<0.000000e+00> : vector<4x256xf32>
    %78 = tpu.matmul %76, %77, %cst_52 {dimension_numbers = #tpu.dot_dimension_numbers<[1], [0], [0], [1], [0, 0, 1, 1], [], []>} : vector<4x4xbf16>, vector<4x256xbf16>, vector<4x256xf32> -> vector<4x256xf32>
    %79 = arith.addf %72, %78 : vector<4x256xf32>
    %c0_53 = arith.constant 0 : index
    %c144 = arith.constant 144 : index
    %80 = vector.load %arg18[%c0_53, %c144] : memref<4x401xf32, #tpu.memory_space<vmem>>, vector<4x256xf32>
    %c2_54 = arith.constant 2 : index
    %c1_55 = arith.constant 1 : index
    %c0_56 = arith.constant 0 : index
    %c0_57 = arith.constant 0 : index
    %81 = vector.load %arg2[%c2_54, %c1_55, %c0_56, %c0_57] : memref<3x3x4x4xbf16, #tpu.memory_space<vmem>>, vector<1x1x4x4xbf16>
    %82 = vector.shape_cast %81 : vector<1x1x4x4xbf16> to vector<4x4xbf16>
    %83 = arith.truncf %80 : vector<4x256xf32> to vector<4x256xbf16>
    %cst_58 = arith.constant dense<0.000000e+00> : vector<4x256xf32>
    %84 = tpu.matmul %82, %83, %cst_58 {dimension_numbers = #tpu.dot_dimension_numbers<[1], [0], [0], [1], [0, 0, 1, 1], [], []>} : vector<4x4xbf16>, vector<4x256xbf16>, vector<4x256xf32> -> vector<4x256xf32>
    %85 = arith.addf %79, %84 : vector<4x256xf32>
    %c0_59 = arith.constant 0 : index
    %c145 = arith.constant 145 : index
    %86 = vector.load %arg18[%c0_59, %c145] : memref<4x401xf32, #tpu.memory_space<vmem>>, vector<4x256xf32>
    %87 = arith.mulf %86, %28 : vector<4x256xf32>
    %c2_60 = arith.constant 2 : index
    %c2_61 = arith.constant 2 : index
    %c0_62 = arith.constant 0 : index
    %c0_63 = arith.constant 0 : index
    %88 = vector.load %arg2[%c2_60, %c2_61, %c0_62, %c0_63] : memref<3x3x4x4xbf16, #tpu.memory_space<vmem>>, vector<1x1x4x4xbf16>
    %89 = vector.shape_cast %88 : vector<1x1x4x4xbf16> to vector<4x4xbf16>
    %90 = arith.truncf %87 : vector<4x256xf32> to vector<4x256xbf16>
    %cst_64 = arith.constant dense<0.000000e+00> : vector<4x256xf32>
    %91 = tpu.matmul %89, %90, %cst_64 {dimension_numbers = #tpu.dot_dimension_numbers<[1], [0], [0], [1], [0, 0, 1, 1], [], []>} : vector<4x4xbf16>, vector<4x256xbf16>, vector<4x256xf32> -> vector<4x256xf32>
    %92 = arith.addf %85, %91 : vector<4x256xf32>
    %c0_65 = arith.constant 0 : index
    %c0_66 = arith.constant 0 : index
    %93 = vector.load %arg3[%c0_65, %c0_66] : memref<4x1xf32, #tpu.memory_space<vmem>>, vector<4x1xf32>
    %94 = vector.broadcast %93 : vector<4x1xf32> to vector<4x256xf32>
    %95 = arith.addf %92, %94 : vector<4x256xf32>
    %cst_67 = arith.constant 0.000000e+00 : f32
    %96 = vector.broadcast %cst_67 : f32 to vector<4x256xf32>
    %97 = arith.maximumf %95, %96 : vector<4x256xf32>
    %c0_68 = arith.constant 0 : index
    %c128_69 = arith.constant 128 : index
    %98 = vector.load %arg18[%c0_68, %c128_69] : memref<4x401xf32, #tpu.memory_space<vmem>>, vector<4x256xf32>
    tpu.vector_store %arg18[%c0_68, %c128_69], %97 {strides = array<i32>} : memref<4x401xf32, #tpu.memory_space<vmem>>, vector<4x256xf32>,
    %cst_70 = arith.constant 0.000000e+00 : f32
    %99 = vector.broadcast %cst_70 : f32 to vector<4x256xf32>
    %c0_71 = arith.constant 0 : index
    %c111_72 = arith.constant 111 : index
    %100 = vector.load %arg18[%c0_71, %c111_72] : memref<4x401xf32, #tpu.memory_space<vmem>>, vector<4x256xf32>
    %101 = arith.mulf %100, %24 : vector<4x256xf32>
    %c0_73 = arith.constant 0 : index
    %c0_74 = arith.constant 0 : index
    %c0_75 = arith.constant 0 : index
    %c0_76 = arith.constant 0 : index
    %102 = vector.load %arg4[%c0_73, %c0_74, %c0_75, %c0_76] : memref<3x3x4x4xbf16, #tpu.memory_space<vmem>>, vector<1x1x4x4xbf16>
    %103 = vector.shape_cast %102 : vector<1x1x4x4xbf16> to vector<4x4xbf16>
    %104 = arith.truncf %101 : vector<4x256xf32> to vector<4x256xbf16>
    %cst_77 = arith.constant dense<0.000000e+00> : vector<4x256xf32>
    %105 = tpu.matmul %103, %104, %cst_77 {dimension_numbers = #tpu.dot_dimension_numbers<[1], [0], [0], [1], [0, 0, 1, 1], [], []>} : vector<4x4xbf16>, vector<4x256xbf16>, vector<4x256xf32> -> vector<4x256xf32>
    %106 = arith.addf %99, %105 : vector<4x256xf32>
    %c0_78 = arith.constant 0 : index
    %c112_79 = arith.constant 112 : index
    %107 = vector.load %arg18[%c0_78, %c112_79] : memref<4x401xf32, #tpu.memory_space<vmem>>, vector<4x256xf32>
    %c0_80 = arith.constant 0 : index
    %c1_81 = arith.constant 1 : index
    %c0_82 = arith.constant 0 : index
    %c0_83 = arith.constant 0 : index
    %108 = vector.load %arg4[%c0_80, %c1_81, %c0_82, %c0_83] : memref<3x3x4x4xbf16, #tpu.memory_space<vmem>>, vector<1x1x4x4xbf16>
    %109 = vector.shape_cast %108 : vector<1x1x4x4xbf16> to vector<4x4xbf16>
    %110 = arith.truncf %107 : vector<4x256xf32> to vector<4x256xbf16>
    %cst_84 = arith.constant dense<0.000000e+00> : vector<4x256xf32>
    %111 = tpu.matmul %109, %110, %cst_84 {dimension_numbers = #tpu.dot_dimension_numbers<[1], [0], [0], [1], [0, 0, 1, 1], [], []>} : vector<4x4xbf16>, vector<4x256xbf16>, vector<4x256xf32> -> vector<4x256xf32>
    %112 = arith.addf %106, %111 : vector<4x256xf32>
    %c0_85 = arith.constant 0 : index
    %c113_86 = arith.constant 113 : index
    %113 = vector.load %arg18[%c0_85, %c113_86] : memref<4x401xf32, #tpu.memory_space<vmem>>, vector<4x256xf32>
    %114 = arith.mulf %113, %28 : vector<4x256xf32>
    %c0_87 = arith.constant 0 : index
    %c2_88 = arith.constant 2 : index
    %c0_89 = arith.constant 0 : index
    %c0_90 = arith.constant 0 : index
    %115 = vector.load %arg4[%c0_87, %c2_88, %c0_89, %c0_90] : memref<3x3x4x4xbf16, #tpu.memory_space<vmem>>, vector<1x1x4x4xbf16>
    %116 = vector.shape_cast %115 : vector<1x1x4x4xbf16> to vector<4x4xbf16>
    %117 = arith.truncf %114 : vector<4x256xf32> to vector<4x256xbf16>
    %cst_91 = arith.constant dense<0.000000e+00> : vector<4x256xf32>
    %118 = tpu.matmul %116, %117, %cst_91 {dimension_numbers = #tpu.dot_dimension_numbers<[1], [0], [0], [1], [0, 0, 1, 1], [], []>} : vector<4x4xbf16>, vector<4x256xbf16>, vector<4x256xf32> -> vector<4x256xf32>
    %119 = arith.addf %112, %118 : vector<4x256xf32>
    %c0_92 = arith.constant 0 : index
    %c127_93 = arith.constant 127 : index
    %120 = vector.load %arg18[%c0_92, %c127_93] : memref<4x401xf32, #tpu.memory_space<vmem>>, vector<4x256xf32>
    %121 = arith.mulf %120, %24 : vector<4x256xf32>
    %c1_94 = arith.constant 1 : index
    %c0_95 = arith.constant 0 : index
    %c0_96 = arith.constant 0 : index
    %c0_97 = arith.constant 0 : index
    %122 = vector.load %arg4[%c1_94, %c0_95, %c0_96, %c0_97] : memref<3x3x4x4xbf16, #tpu.memory_space<vmem>>, vector<1x1x4x4xbf16>
    %123 = vector.shape_cast %122 : vector<1x1x4x4xbf16> to vector<4x4xbf16>
    %124 = arith.truncf %121 : vector<4x256xf32> to vector<4x256xbf16>
    %cst_98 = arith.constant dense<0.000000e+00> : vector<4x256xf32>
    %125 = tpu.matmul %123, %124, %cst_98 {dimension_numbers = #tpu.dot_dimension_numbers<[1], [0], [0], [1], [0, 0, 1, 1], [], []>} : vector<4x4xbf16>, vector<4x256xbf16>, vector<4x256xf32> -> vector<4x256xf32>
    %126 = arith.addf %119, %125 : vector<4x256xf32>
    %c0_99 = arith.constant 0 : index
    %c128_100 = arith.constant 128 : index
    %127 = vector.load %arg18[%c0_99, %c128_100] : memref<4x401xf32, #tpu.memory_space<vmem>>, vector<4x256xf32>
    %c1_101 = arith.constant 1 : index
    %c1_102 = arith.constant 1 : index
    %c0_103 = arith.constant 0 : index
    %c0_104 = arith.constant 0 : index
    %128 = vector.load %arg4[%c1_101, %c1_102, %c0_103, %c0_104] : memref<3x3x4x4xbf16, #tpu.memory_space<vmem>>, vector<1x1x4x4xbf16>
    %129 = vector.shape_cast %128 : vector<1x1x4x4xbf16> to vector<4x4xbf16>
    %130 = arith.truncf %127 : vector<4x256xf32> to vector<4x256xbf16>
    %cst_105 = arith.constant dense<0.000000e+00> : vector<4x256xf32>
    %131 = tpu.matmul %129, %130, %cst_105 {dimension_numbers = #tpu.dot_dimension_numbers<[1], [0], [0], [1], [0, 0, 1, 1], [], []>} : vector<4x4xbf16>, vector<4x256xbf16>, vector<4x256xf32> -> vector<4x256xf32>
    %132 = arith.addf %126, %131 : vector<4x256xf32>
    %c0_106 = arith.constant 0 : index
    %c129_107 = arith.constant 129 : index
    %133 = vector.load %arg18[%c0_106, %c129_107] : memref<4x401xf32, #tpu.memory_space<vmem>>, vector<4x256xf32>
    %134 = arith.mulf %133, %28 : vector<4x256xf32>
    %c1_108 = arith.constant 1 : index
    %c2_109 = arith.constant 2 : index
    %c0_110 = arith.constant 0 : index
    %c0_111 = arith.constant 0 : index
    %135 = vector.load %arg4[%c1_108, %c2_109, %c0_110, %c0_111] : memref<3x3x4x4xbf16, #tpu.memory_space<vmem>>, vector<1x1x4x4xbf16>
    %136 = vector.shape_cast %135 : vector<1x1x4x4xbf16> to vector<4x4xbf16>
    %137 = arith.truncf %134 : vector<4x256xf32> to vector<4x256xbf16>
    %cst_112 = arith.constant dense<0.000000e+00> : vector<4x256xf32>
    %138 = tpu.matmul %136, %137, %cst_112 {dimension_numbers = #tpu.dot_dimension_numbers<[1], [0], [0], [1], [0, 0, 1, 1], [], []>} : vector<4x4xbf16>, vector<4x256xbf16>, vector<4x256xf32> -> vector<4x256xf32>
    %139 = arith.addf %132, %138 : vector<4x256xf32>
    %c0_113 = arith.constant 0 : index
    %c143_114 = arith.constant 143 : index
    %140 = vector.load %arg18[%c0_113, %c143_114] : memref<4x401xf32, #tpu.memory_space<vmem>>, vector<4x256xf32>
    %141 = arith.mulf %140, %24 : vector<4x256xf32>
    %c2_115 = arith.constant 2 : index
    %c0_116 = arith.constant 0 : index
    %c0_117 = arith.constant 0 : index
    %c0_118 = arith.constant 0 : index
    %142 = vector.load %arg4[%c2_115, %c0_116, %c0_117, %c0_118] : memref<3x3x4x4xbf16, #tpu.memory_space<vmem>>, vector<1x1x4x4xbf16>
    %143 = vector.shape_cast %142 : vector<1x1x4x4xbf16> to vector<4x4xbf16>
    %144 = arith.truncf %141 : vector<4x256xf32> to vector<4x256xbf16>
    %cst_119 = arith.constant dense<0.000000e+00> : vector<4x256xf32>
    %145 = tpu.matmul %143, %144, %cst_119 {dimension_numbers = #tpu.dot_dimension_numbers<[1], [0], [0], [1], [0, 0, 1, 1], [], []>} : vector<4x4xbf16>, vector<4x256xbf16>, vector<4x256xf32> -> vector<4x256xf32>
    %146 = arith.addf %139, %145 : vector<4x256xf32>
    %c0_120 = arith.constant 0 : index
    %c144_121 = arith.constant 144 : index
    %147 = vector.load %arg18[%c0_120, %c144_121] : memref<4x401xf32, #tpu.memory_space<vmem>>, vector<4x256xf32>
    %c2_122 = arith.constant 2 : index
    %c1_123 = arith.constant 1 : index
    %c0_124 = arith.constant 0 : index
    %c0_125 = arith.constant 0 : index
    %148 = vector.load %arg4[%c2_122, %c1_123, %c0_124, %c0_125] : memref<3x3x4x4xbf16, #tpu.memory_space<vmem>>, vector<1x1x4x4xbf16>
    %149 = vector.shape_cast %148 : vector<1x1x4x4xbf16> to vector<4x4xbf16>
    %150 = arith.truncf %147 : vector<4x256xf32> to vector<4x256xbf16>
    %cst_126 = arith.constant dense<0.000000e+00> : vector<4x256xf32>
    %151 = tpu.matmul %149, %150, %cst_126 {dimension_numbers = #tpu.dot_dimension_numbers<[1], [0], [0], [1], [0, 0, 1, 1], [], []>} : vector<4x4xbf16>, vector<4x256xbf16>, vector<4x256xf32> -> vector<4x256xf32>
    %152 = arith.addf %146, %151 : vector<4x256xf32>
    %c0_127 = arith.constant 0 : index
    %c145_128 = arith.constant 145 : index
    %153 = vector.load %arg18[%c0_127, %c145_128] : memref<4x401xf32, #tpu.memory_space<vmem>>, vector<4x256xf32>
    %154 = arith.mulf %153, %28 : vector<4x256xf32>
    %c2_129 = arith.constant 2 : index
    %c2_130 = arith.constant 2 : index
    %c0_131 = arith.constant 0 : index
    %c0_132 = arith.constant 0 : index
    %155 = vector.load %arg4[%c2_129, %c2_130, %c0_131, %c0_132] : memref<3x3x4x4xbf16, #tpu.memory_space<vmem>>, vector<1x1x4x4xbf16>
    %156 = vector.shape_cast %155 : vector<1x1x4x4xbf16> to vector<4x4xbf16>
    %157 = arith.truncf %154 : vector<4x256xf32> to vector<4x256xbf16>
    %cst_133 = arith.constant dense<0.000000e+00> : vector<4x256xf32>
    %158 = tpu.matmul %156, %157, %cst_133 {dimension_numbers = #tpu.dot_dimension_numbers<[1], [0], [0], [1], [0, 0, 1, 1], [], []>} : vector<4x4xbf16>, vector<4x256xbf16>, vector<4x256xf32> -> vector<4x256xf32>
    %159 = arith.addf %152, %158 : vector<4x256xf32>
    %c0_134 = arith.constant 0 : index
    %c0_135 = arith.constant 0 : index
    %160 = vector.load %arg5[%c0_134, %c0_135] : memref<4x1xf32, #tpu.memory_space<vmem>>, vector<4x1xf32>
    %161 = vector.broadcast %160 : vector<4x1xf32> to vector<4x256xf32>
    %162 = arith.addf %159, %161 : vector<4x256xf32>
    %163 = arith.truncf %162 : vector<4x256xf32> to vector<4x256xbf16>
    %cst_136 = arith.constant dense<0.000000e+00> : vector<4xf32>
    %164 = vector.multi_reduction <add>, %162, %cst_136 [1] : vector<4x256xf32> to vector<4xf32>
    %165 = vector.shape_cast %164 : vector<4xf32> to vector<4x1xf32>
    %cst_137 = arith.constant 2.560000e+02 : f32
    %166 = vector.broadcast %cst_137 : f32 to vector<4x1xf32>
    %167 = arith.divf %165, %166 : vector<4x1xf32>
    %c0_138 = arith.constant 0 : index
    %c0_139 = arith.constant 0 : index
    %168 = vector.load %arg6[%c0_138, %c0_139] : memref<1x4xbf16, #tpu.memory_space<vmem>>, vector<1x4xbf16>
    %169 = arith.truncf %167 : vector<4x1xf32> to vector<4x1xbf16>
    %cst_140 = arith.constant dense<0.000000e+00> : vector<1x1xf32>
    %170 = tpu.matmul %168, %169, %cst_140 {dimension_numbers = #tpu.dot_dimension_numbers<[1], [0], [0], [1], [0, 0, 1, 1], [], []>} : vector<1x4xbf16>, vector<4x1xbf16>, vector<1x1xf32> -> vector<1x1xf32>
    %c0_141 = arith.constant 0 : index
    %c0_142 = arith.constant 0 : index
    %171 = vector.load %arg7[%c0_141, %c0_142] : memref<1x1xf32, #tpu.memory_space<vmem>>, vector<1x1xf32>
    %172 = arith.addf %170, %171 : vector<1x1xf32>
    %cst_143 = arith.constant 0.000000e+00 : f32
    %173 = vector.broadcast %cst_143 : f32 to vector<1x1xf32>
    %174 = arith.maximumf %172, %173 : vector<1x1xf32>
    %c0_144 = arith.constant 0 : index
    %c0_145 = arith.constant 0 : index
    %175 = vector.load %arg8[%c0_144, %c0_145] : memref<4x1xbf16, #tpu.memory_space<vmem>>, vector<4x1xbf16>
    %176 = arith.truncf %174 : vector<1x1xf32> to vector<1x1xbf16>
    %cst_146 = arith.constant dense<0.000000e+00> : vector<4x1xf32>
    %177 = tpu.matmul %175, %176, %cst_146 {dimension_numbers = #tpu.dot_dimension_numbers<[1], [0], [0], [1], [0, 0, 1, 1], [], []>} : vector<4x1xbf16>, vector<1x1xbf16>, vector<4x1xf32> -> vector<4x1xf32>
    %c0_147 = arith.constant 0 : index
    %c0_148 = arith.constant 0 : index
    %178 = vector.load %arg9[%c0_147, %c0_148] : memref<4x1xf32, #tpu.memory_space<vmem>>, vector<4x1xf32>
    %179 = arith.addf %177, %178 : vector<4x1xf32>
    %180 = arith.negf %179 : vector<4x1xf32>
    %181 = math.exp %180 : vector<4x1xf32>
    %cst_149 = arith.constant 1.000000e+00 : f32
    %182 = vector.broadcast %cst_149 : f32 to vector<4x1xf32>
    %183 = arith.addf %182, %181 : vector<4x1xf32>
    %184 = arith.divf %182, %183 : vector<4x1xf32>
    %c0_150 = arith.constant 0 : index
    %c0_151 = arith.constant 0 : index
    %185 = vector.load %arg10[%c0_150, %c0_151] : memref<8x4xbf16, #tpu.memory_space<vmem>>, vector<8x4xbf16>
    %cst_152 = arith.constant dense<0.000000e+00> : vector<8x256xf32>
    %186 = tpu.matmul %185, %163, %cst_152 {dimension_numbers = #tpu.dot_dimension_numbers<[1], [0], [0], [1], [0, 0, 1, 1], [], []>} : vector<8x4xbf16>, vector<4x256xbf16>, vector<8x256xf32> -> vector<8x256xf32>
    %c0_153 = arith.constant 0 : index
    %c0_154 = arith.constant 0 : index
    %187 = vector.load %arg11[%c0_153, %c0_154] : memref<8x1xf32, #tpu.memory_space<vmem>>, vector<8x1xf32>
    %188 = vector.broadcast %187 : vector<8x1xf32> to vector<8x256xf32>
    %189 = arith.addf %186, %188 : vector<8x256xf32>
    %cst_155 = arith.constant 0.000000e+00 : f32
    %190 = vector.broadcast %cst_155 : f32 to vector<8x256xf32>
    %191 = arith.maximumf %189, %190 : vector<8x256xf32>
    %c0_156 = arith.constant 0 : index
    %c0_157 = arith.constant 0 : index
    %192 = vector.load %arg12[%c0_156, %c0_157] : memref<4x8xbf16, #tpu.memory_space<vmem>>, vector<4x8xbf16>
    %193 = arith.truncf %191 : vector<8x256xf32> to vector<8x256xbf16>
    %cst_158 = arith.constant dense<0.000000e+00> : vector<4x256xf32>
    %194 = tpu.matmul %192, %193, %cst_158 {dimension_numbers = #tpu.dot_dimension_numbers<[1], [0], [0], [1], [0, 0, 1, 1], [], []>} : vector<4x8xbf16>, vector<8x256xbf16>, vector<4x256xf32> -> vector<4x256xf32>
    %c0_159 = arith.constant 0 : index
    %c0_160 = arith.constant 0 : index
    %195 = vector.load %arg13[%c0_159, %c0_160] : memref<4x1xf32, #tpu.memory_space<vmem>>, vector<4x1xf32>
    %196 = vector.broadcast %195 : vector<4x1xf32> to vector<4x256xf32>
    %197 = arith.addf %194, %196 : vector<4x256xf32>
    %198 = arith.negf %197 : vector<4x256xf32>
    %199 = math.exp %198 : vector<4x256xf32>
    %cst_161 = arith.constant 1.000000e+00 : f32
    %200 = vector.broadcast %cst_161 : f32 to vector<4x256xf32>
    %201 = arith.addf %200, %199 : vector<4x256xf32>
    %202 = arith.divf %200, %201 : vector<4x256xf32>
    %203 = arith.mulf %162, %162 : vector<4x256xf32>
    %204 = vector.broadcast %184 : vector<4x1xf32> to vector<4x256xf32>
    %205 = arith.mulf %203, %204 : vector<4x256xf32>
    %206 = arith.mulf %162, %202 : vector<4x256xf32>
    %c0_162 = arith.constant 0 : index
    %c0_163 = arith.constant 0 : index
    %207 = vector.load %arg14[%c0_162, %c0_163] : memref<4x4xbf16, #tpu.memory_space<vmem>>, vector<4x4xbf16>
    %208 = arith.truncf %205 : vector<4x256xf32> to vector<4x256xbf16>
    %cst_164 = arith.constant dense<0.000000e+00> : vector<4x256xf32>
    %209 = tpu.matmul %207, %208, %cst_164 {dimension_numbers = #tpu.dot_dimension_numbers<[1], [0], [0], [1], [0, 0, 1, 1], [], []>} : vector<4x4xbf16>, vector<4x256xbf16>, vector<4x256xf32> -> vector<4x256xf32>
    %c0_165 = arith.constant 0 : index
    %c0_166 = arith.constant 0 : index
    %210 = vector.load %arg15[%c0_165, %c0_166] : memref<4x4xbf16, #tpu.memory_space<vmem>>, vector<4x4xbf16>
    %211 = arith.truncf %206 : vector<4x256xf32> to vector<4x256xbf16>
    %cst_167 = arith.constant dense<0.000000e+00> : vector<4x256xf32>
    %212 = tpu.matmul %210, %211, %cst_167 {dimension_numbers = #tpu.dot_dimension_numbers<[1], [0], [0], [1], [0, 0, 1, 1], [], []>} : vector<4x4xbf16>, vector<4x256xbf16>, vector<4x256xf32> -> vector<4x256xf32>
    %213 = arith.addf %209, %212 : vector<4x256xf32>
    %c0_168 = arith.constant 0 : index
    %c0_169 = arith.constant 0 : index
    %214 = vector.load %arg16[%c0_168, %c0_169] : memref<4x1xf32, #tpu.memory_space<vmem>>, vector<4x1xf32>
    %215 = vector.broadcast %214 : vector<4x1xf32> to vector<4x256xf32>
    %216 = arith.addf %213, %215 : vector<4x256xf32>
    %217 = arith.addf %30, %216 : vector<4x256xf32>
    %c0_170 = arith.constant 0 : index
    %c0_171 = arith.constant 0 : index
    %c0_172 = arith.constant 0 : index
    %218 = vector.load %arg17[%c0_170, %c0_171, %c0_172] : memref<1x4x256xf32, #tpu.memory_space<vmem>>, vector<1x4x256xf32>
    %219 = vector.shape_cast %218 : vector<1x4x256xf32> to vector<4x256xf32>
    %220 = vector.shape_cast %217 : vector<4x256xf32> to vector<1x4x256xf32>
    tpu.vector_store %arg17[%c0_170, %c0_171, %c0_172], %220 {strides = array<i32>} : memref<1x4x256xf32, #tpu.memory_space<vmem>>, vector<1x4x256xf32>,
    return
  }
  func.func @transform_0(%arg0: i32) -> (i32, i32, i32) {
    %c0_i32 = arith.constant 0 : i32
    %c0_i32_0 = arith.constant 0 : i32
    %c0_i32_1 = arith.constant 0 : i32
    return %arg0, %c0_i32, %c0_i32_0 : i32, i32, i32
  }
  func.func @transform_1(%arg0: i32) -> (i32, i32, i32, i32) {
    %c0_i32 = arith.constant 0 : i32
    %c0_i32_0 = arith.constant 0 : i32
    %c0_i32_1 = arith.constant 0 : i32
    %c0_i32_2 = arith.constant 0 : i32
    %c0_i32_3 = arith.constant 0 : i32
    return %c0_i32, %c0_i32_0, %c0_i32_1, %c0_i32_2 : i32, i32, i32, i32
  }
  func.func @transform_2(%arg0: i32) -> (i32, i32) {
    %c0_i32 = arith.constant 0 : i32
    %c0_i32_0 = arith.constant 0 : i32
    %c0_i32_1 = arith.constant 0 : i32
    return %c0_i32, %c0_i32_0 : i32, i32
  }
  func.func @transform_3(%arg0: i32) -> (i32, i32, i32, i32) {
    %c0_i32 = arith.constant 0 : i32
    %c0_i32_0 = arith.constant 0 : i32
    %c0_i32_1 = arith.constant 0 : i32
    %c0_i32_2 = arith.constant 0 : i32
    %c0_i32_3 = arith.constant 0 : i32
    return %c0_i32, %c0_i32_0, %c0_i32_1, %c0_i32_2 : i32, i32, i32, i32
  }
  func.func @transform_4(%arg0: i32) -> (i32, i32) {
    %c0_i32 = arith.constant 0 : i32
    %c0_i32_0 = arith.constant 0 : i32
    %c0_i32_1 = arith.constant 0 : i32
    return %c0_i32, %c0_i32_0 : i32, i32
  }
  func.func @transform_5(%arg0: i32) -> (i32, i32) {
    %c0_i32 = arith.constant 0 : i32
    %c0_i32_0 = arith.constant 0 : i32
    %c0_i32_1 = arith.constant 0 : i32
    return %c0_i32, %c0_i32_0 : i32, i32
  }
  func.func @transform_6(%arg0: i32) -> (i32, i32) {
    %c0_i32 = arith.constant 0 : i32
    %c0_i32_0 = arith.constant 0 : i32
    %c0_i32_1 = arith.constant 0 : i32
    return %c0_i32, %c0_i32_0 : i32, i32
  }
  func.func @transform_7(%arg0: i32) -> (i32, i32) {
    %c0_i32 = arith.constant 0 : i32
    %c0_i32_0 = arith.constant 0 : i32
    %c0_i32_1 = arith.constant 0 : i32
    return %c0_i32, %c0_i32_0 : i32, i32
  }
  func.func @transform_8(%arg0: i32) -> (i32, i32) {
    %c0_i32 = arith.constant 0 : i32
    %c0_i32_0 = arith.constant 0 : i32
    %c0_i32_1 = arith.constant 0 : i32
    return %c0_i32, %c0_i32_0 : i32, i32
  }
  func.func @transform_9(%arg0: i32) -> (i32, i32) {
    %c0_i32 = arith.constant 0 : i32
    %c0_i32_0 = arith.constant 0 : i32
    %c0_i32_1 = arith.constant 0 : i32
    return %c0_i32, %c0_i32_0 : i32, i32
  }
  func.func @transform_10(%arg0: i32) -> (i32, i32) {
    %c0_i32 = arith.constant 0 : i32
    %c0_i32_0 = arith.constant 0 : i32
    %c0_i32_1 = arith.constant 0 : i32
    return %c0_i32, %c0_i32_0 : i32, i32
  }
  func.func @transform_11(%arg0: i32) -> (i32, i32) {
    %c0_i32 = arith.constant 0 : i32
    %c0_i32_0 = arith.constant 0 : i32
    %c0_i32_1 = arith.constant 0 : i32
    return %c0_i32, %c0_i32_0 : i32, i32
  }
  func.func @transform_12(%arg0: i32) -> (i32, i32) {
    %c0_i32 = arith.constant 0 : i32
    %c0_i32_0 = arith.constant 0 : i32
    %c0_i32_1 = arith.constant 0 : i32
    return %c0_i32, %c0_i32_0 : i32, i32
  }
  func.func @transform_13(%arg0: i32) -> (i32, i32) {
    %c0_i32 = arith.constant 0 : i32
    %c0_i32_0 = arith.constant 0 : i32
    %c0_i32_1 = arith.constant 0 : i32
    return %c0_i32, %c0_i32_0 : i32, i32
  }
  func.func @transform_14(%arg0: i32) -> (i32, i32) {
    %c0_i32 = arith.constant 0 : i32
    %c0_i32_0 = arith.constant 0 : i32
    %c0_i32_1 = arith.constant 0 : i32
    return %c0_i32, %c0_i32_0 : i32, i32
  }
  func.func @transform_15(%arg0: i32) -> (i32, i32) {
    %c0_i32 = arith.constant 0 : i32
    %c0_i32_0 = arith.constant 0 : i32
    %c0_i32_1 = arith.constant 0 : i32
    return %c0_i32, %c0_i32_0 : i32, i32
  }
  func.func @transform_16(%arg0: i32) -> (i32, i32, i32) {
    %c0_i32 = arith.constant 0 : i32
    %c0_i32_0 = arith.constant 0 : i32
    %c0_i32_1 = arith.constant 0 : i32
    return %arg0, %c0_i32, %c0_i32_0 : i32, i32, i32
  }
}

</mosaic_0001>

<bundles_post_ra>
// kernel: csar_forward.1
= control target key start
LH: loop header
LB: loop body
LE: loop exit
PB: predicated region body
PF: predicated region fallthrough
CT: control target
= control target key end

     0   :  { %s2411_s23 = smov 0   ;;  %s2830_s0 = inlined_call_operand.vmem [shape: f32[2,4,256], index: 0, kind: input, shape index: {}]   ;;  %s2831_s1 = inlined_call_operand.vmem [shape: bf16[3,3,4,4], index: 1, kind: input, shape index: {}]   ;;  %s2832_s2 = inlined_call_operand.vmem [shape: f32[4,1], index: 2, kind: input, shape index: {}]   ;;  %s2833_s3 = inlined_call_operand.vmem [shape: bf16[3,3,4,4], index: 3, kind: input, shape index: {}]   ;;  %s2834_s4 = inlined_call_operand.vmem [shape: f32[4,1], index: 4, kind: input, shape index: {}]   ;;  %s2835_s5 = inlined_call_operand.vmem [shape: bf16[1,4], index: 5, kind: input, shape index: {}]   ;;  %s2836_s6 = inlined_call_operand.<no memory space> [shape: f32[1,1], index: 6, kind: input, shape index: {}]   ;;  %s2837_s7 = inlined_call_operand.vmem [shape: bf16[4,1], index: 7, kind: input, shape index: {}]   ;;  %s2838_s8 = inlined_call_operand.vmem [shape: f32[4,1], index: 8, kind: input, shape index: {}]   ;;  %s2839_s9 = inlined_call_operand.vmem [shape: bf16[8,4], index: 9, kind: input, shape index: {}]   ;;  %s2840_s10 = inlined_call_operand.vmem [shape: f32[8,1], index: 10, kind: input, shape index: {}]   ;;  %s2841_s11 = inlined_call_operand.vmem [shape: bf16[4,8], index: 11, kind: input, shape index: {}]   ;;  %s2842_s12 = inlined_call_operand.vmem [shape: f32[4,1], index: 12, kind: input, shape index: {}]   ;;  %s2843_s13 = inlined_call_operand.vmem [shape: bf16[4,4], index: 13, kind: input, shape index: {}]   ;;  %s2844_s14 = inlined_call_operand.vmem [shape: bf16[4,4], index: 14, kind: input, shape index: {}]   ;;  %s2845_s15 = inlined_call_operand.vmem [shape: f32[4,1], index: 15, kind: input, shape index: {}]   ;;  %s2846_s16 = inlined_call_operand.vmem [shape: f32[2,4,256], index: 16, kind: output, shape index: {}]  }
   0x1   :  { %2848 = sst [smem:[#allocation4_spill]] %s2830_s0  ;;  %v21_v0 = vstv %s2836_s6 }
   0x2   :  { %22 = vst [vmem:[#allocation3] sm:$0x1] %v21_v0 }
   0x3 LB: > { %s2186_s24 = sadd.s32 4294967295, %s2310_s23   ;;  %p2190_p0 = scmp.ge.s32.totalorder %s2310_s23, 1  ;;  %s2310_s23 = sphi %s2411_s23, %s28_s23  }
   0x4   : > { %p464_p1 = scmp.lt.s32.totalorder %s2310_s23, 3 }
   0x6   : > { %p465_p2 = pnand %p2190_p0, %p464_p1 }
   0x7   : > { %s2313_s6 = smov (!%p465_p2), 111   ;;  %s2314_s25 = smov (!%p465_p2), 127  }
   0x8   : > { %468 = sbr.rel (%p465_p2) target bundleno = 1577 (0x629), region = 84  ;;  %s2315_s26 = smov (!%p465_p2), 15  }
   0x9   : > { %s2316_s27 = smov (!%p465_p2), 113   ;;  %s2317_s28 = smov (!%p465_p2), 1  }
   0xa   : > { %p514_p3 = scmp.lt.s32.totalorder (!%p465_p2), %s2186_s24, 1  ;;  %s2849_s17 = sld [smem:[#allocation4_spill]] (!%p465_p2) }
   0xb   : > { %s2318_s19 = smov (!%p465_p2), 16   ;;  %s2319_s20 = smov (!%p465_p2), 17  }
   0xc   : > { %s2320_s21 = smov (!%p465_p2), 112  }
   0xd   : > { %vm526_vm0 = vcmask 134144   ;;  %v528_v1 = vlaneseq  ;;  %v2312_v2 = vmov 0.0   ;;  %vm574_vm4 = vcmask 1043456   ;;  %s2852_s24 = smov (!%p514_p3, %s2186_s24), 1 }
   0xe   : > { %525 = vst [vmem:[#allocation2] sm:$0xf] %v2312_v2  ;;  %s2847_s29 = sshll.u32 %s2852_s24, 3  ;;  %vm579_vm6 = vcmask 908288   ;;  %vm723_vm7 = vcmask 924672   ;;  %vm799_vm8 = vcmask 1039360  }
   0xf   : > { %v529_v3 = vand.u32 127, %v528_v1  ;;  %527 = vst.msk [vmem:[#allocation2 + $0xc] sm:$0xf] %vm526_vm0, %v2312_v2  ;;  %vm830_vm9 = vcmask 7168   ;;  %vm754_vm10 = vcmask 121856   ;;  %vm676_vm11 = vcmask 138240  }
  0x10   : > { %s518_s18 = scalar_lea.vmem %s2849_s17, %s2847_s29  ;;  %vm627_vm12 = vcmask 130048   ;;  %vm634_vm13 = vcmask 1041408   ;;  %vm630_vm14 = vcmask 31744   ;;  %vm1097_vm15 = vcmask 916480   ;;  %s2850_s29 = sshll.u32 %s2852_s24, 3 }
  0x11   : > { %v530_v4 = vadd.s32 128, %v529_v3  ;;  %v535_v5 = vand.u32 15, %v529_v3  ;;  %v2442_v15 = vld [vmem:[%s518_s18] sm:$0xff] }
  0x12   : > { %568 = vst [vmem:[#allocation2 + $0x4] sm:$0xff] %v2442_v15 }
  0x13   : > { %v542_v6 = vand.u32 15, %v530_v4  ;;  %vm555_vm1 = vcmp.gt.s32.totalorder %v535_v5, 0  ;;  %vm561_vm5 = vcmp.lt.s32.totalorder %v535_v5, 15 }
  0x14   : > { %v2195_v7 = vsel %vm555_vm1, 1.0, %v2312_v2  ;;  %v2197_v13 = vsel %vm561_vm5, 1.0, %v2312_v2  ;;  %vm1955_vm1 = vcmask 64512  }
  0x15   : > { %vm556_vm2 = vcmp.gt.s32.totalorder %v542_v6, 0  ;;  %vm562_vm3 = vcmp.lt.s32.totalorder %v542_v6, 15 }
  0x16   : > { %v2196_v8 = vsel %vm556_vm2, 1.0, %v2312_v2  ;;  %v2198_v10 = vsel %vm562_vm3, 1.0, %v2312_v2  ;;  %v919_v53 = vld [vmem:[#allocation2 + $0xc] sm:$0xf]  ;;  %vm1864_vm2 = vcmask 1040384  }
  0x17   : > { %v573_v9 = vrot.slane %v2196_v8, 4  ;;  %v718_v12 = vrot.slane %v2198_v10, 4  ;;  %v995_v63 = vld [vmem:[#allocation2 + $0xc] sm:$0xf] }
  0x18   : > { %v1071_v10 = vld [vmem:[#allocation2 + $0xc] sm:$0xf] }
  0x19   : > { %v575_v11 = vsel %vm574_vm4, %v2195_v7, %v573_v9  ;;  %v2424_v14 = vsel %vm574_vm4, %v2197_v13, %v718_v12  ;;  %v570_v17 = vld [vmem:[#allocation2 + $0x8] sm:$0xf]  ;;  %v569_v18 = vld [vmem:[#allocation2] sm:$0xff] }
  0x1a   : > { %576 = vrot.lane.b32.xlu0 %v575_v11, %s2313_s6  ;;  %796 = vrot.lane.b32.xlu1 %v575_v11, %s2314_s25  ;;  %v601_v26 = vld [vmem:[#allocation2 + $0x8] sm:$0xf] }
  0x1b   : > { %996 = vrot.lane.b32.xlu2 %v575_v11, %s2315_s26  ;;  %v715_v30 = vld [vmem:[#allocation2 + $0x8] sm:$0xf] }
  0x1c   : > { %v795_v42 = vld [vmem:[#allocation2 + $0x8] sm:$0xf] }
  0x22   : > { %720 = vrot.lane.b32.xlu0 %v2424_v14, %s2316_s27  ;;  %920 = vrot.lane.b32.xlu1 %v2424_v14, %s2317_s28 }
  0x75   : > { %v997_v56 = vpop.permute.xlu2 %996 }
  0x76   : > { %v2483_v62 = vrot.slane %v997_v56, 4 }
  0x78   : > { %v1004_v1 = vmul.f32 %v2483_v62, %v995_v63  ;;  %v2498_v8 = vsel %vm754_vm10, %v2483_v62, %v997_v56 }
  0x79   : > { %v1003_v9 = vmul.f32 %v2498_v8, %v2442_v15 }
  0x8c   : > { %v577_v16 = vpop.permute.xlu0 %576  ;;  %v797_v31 = vpop.permute.xlu1 %796 }
  0x8d   : > { %v2445_v19 = vrot.slane %v577_v16, 4  ;;  %v2461_v34 = vrot.slane %v797_v31, 4 }
  0x8f   : > { %v2449_v20 = vsel %vm579_vm6, %v2445_v19, %v577_v16  ;;  %v584_v21 = vmul.f32 %v2445_v19, %v570_v17  ;;  %v2465_v41 = vsel %vm799_vm8, %v2461_v34, %v797_v31  ;;  %v804_v44 = vmul.f32 %v2461_v34, %v795_v42 }
  0x90   : > { %v583_v22 = vmul.f32 %v2449_v20, %v569_v18  ;;  %v803_v43 = vmul.f32 %v2465_v41, %v569_v18 }
  0x91   : > { %590 = vst [vmem:[#allocation1 + $0x10] ss:$2 sm:$0xff] %v584_v21 }
  0x92   : > { %588 = vst [vmem:[#allocation1] ss:$2 sm:$0xff] %v583_v22 }
  0x94   : > { %v721_v23 = vpop.permute.xlu0 %720  ;;  %v921_v45 = vpop.permute.xlu1 %920 }
  0x95   : > { %v2453_v24 = vrot.slane %v721_v23, 4  ;;  %v2472_v52 = vrot.slane %v921_v45, 4 }
  0x97   : > { %v2457_v29 = vsel %vm723_vm7, %v2453_v24, %v721_v23  ;;  %v728_v33 = vmul.f32 %v2453_v24, %v715_v30  ;;  %v928_v54 = vmul.f32 %v2472_v52, %v919_v53  ;;  %v2481_v61 = vsel %vm830_vm9, %v2472_v52, %v921_v45 }
  0x98   : > { %v593_v25 = vld.sshfl [vmem:[#allocation1 + $0x10] sm:$0xff pattern:$0x75316420]  ;;  %v727_v32 = vmul.f32 %v2457_v29, %v569_v18  ;;  %v927_v0 = vmul.f32 %v2481_v61, %v2442_v15 }
  0x99   : > { %v591_v27 = vld.sshfl [vmem:[#allocation1] sm:$0xff pattern:$0x75316420]  ;;  %v592_v28 = vld.sshfl [vmem:[#allocation1 + $0x8] sm:$0xff pattern:$0x75316420]  ;;  %v599_v51 = vpack.c.bf16 %v593_v25, %v593_v25 }
  0x9a   : > { %606 = vst [vmem:[#allocation1] ss:$2 sm:$0xff] %v569_v18  ;;  %v598_v49 = vpack.c.bf16 %v592_v28, %v592_v28  ;;  %v597_v50 = vpack.c.bf16 %v591_v27, %v591_v27 }
  0x9b   : > { %608 = vst [vmem:[#allocation1 + $0x10] ss:$2 sm:$0xff] %v601_v26 }
  0xa1   : > { %v609_v35 = vld.sshfl [vmem:[#allocation1] sm:$0xff pattern:$0x75316420]  ;;  %v610_v36 = vld.sshfl [vmem:[#allocation1 + $0x8] sm:$0xff pattern:$0x75316420] }
  0xa2   : > { %v611_v37 = vld.sshfl [vmem:[#allocation1 + $0x10] sm:$0xff pattern:$0x75316420]  ;;  %v616_v38 = vpack.c.bf16 %v610_v36, %v610_v36  ;;  %v615_v39 = vpack.c.bf16 %v609_v35, %v609_v35  ;;  %733 = vst [vmem:[#allocation1] ss:$2 sm:$0xff] %v727_v32 }
  0xa3   : > { %v617_v40 = vpack.c.bf16 %v611_v37, %v611_v37  ;;  %735 = vst [vmem:[#allocation1 + $0x10] ss:$2 sm:$0xff] %v728_v33  ;;  %v1138_v37 = vld [vmem:[#allocation2 + $0xc] sm:$0xf] }
  0xa4   : > { %623 = vrot.lane.b32.xlu2 %v616_v38, %s2318_s19  ;;  %621 = vrot.lane.b32.xlu1 %v615_v39, %s2318_s19 }
  0xa5   : > { %625 = vrot.lane.b32.xlu0 %v617_v40, %s2318_s19 }
  0xa9   : > { %v736_v46 = vld.sshfl [vmem:[#allocation1] sm:$0xff pattern:$0x75316420]  ;;  %v737_v47 = vld.sshfl [vmem:[#allocation1 + $0x8] sm:$0xff pattern:$0x75316420] }
  0xaa   : > { %v738_v48 = vld.sshfl [vmem:[#allocation1 + $0x10] sm:$0xff pattern:$0x75316420]  ;;  %809 = vst [vmem:[#allocation1] ss:$2 sm:$0xff] %v803_v43  ;;  %v743_v59 = vpack.c.bf16 %v737_v47, %v737_v47  ;;  %v742_v3 = vpack.c.bf16 %v736_v46, %v736_v46 }
  0xab   : > { %811 = vst [vmem:[#allocation1 + $0x10] ss:$2 sm:$0xff] %v804_v44  ;;  %v744_v55 = vpack.c.bf16 %v738_v48, %v738_v48 }
  0xac   : > { %672 = vrot.lane.b32.xlu2 %v598_v49, %s2319_s20  ;;  %670 = vrot.lane.b32.xlu1 %v597_v50, %s2319_s20 }
  0xad   : > { %674 = vrot.lane.b32.xlu0 %v599_v51, %s2319_s20  ;;  %v2199_v51 = vld [vmem:[%s2831_s1 + $0x2] sm:$0x3] }
  0xb1   : > { %v812_v57 = vld.sshfl [vmem:[#allocation1] sm:$0xff pattern:$0x75316420]  ;;  %v813_v58 = vld.sshfl [vmem:[#allocation1 + $0x8] sm:$0xff pattern:$0x75316420] }
  0xb2   : > { %v814_v60 = vld.sshfl [vmem:[#allocation1 + $0x10] sm:$0xff pattern:$0x75316420]  ;;  %874 = vst [vmem:[#allocation1] ss:$2 sm:$0xff] %v2442_v15  ;;  %v819_v6 = vpack.c.bf16 %v813_v58, %v813_v58  ;;  %v818_v12 = vpack.c.bf16 %v812_v57, %v812_v57 }
  0xb3   : > { %935 = vst [vmem:[#allocation1 + $0x10] ss:$2 sm:$0xff] %v928_v54  ;;  %v820_v2 = vpack.c.bf16 %v814_v60, %v814_v60 }
  0xb4   : > { %1139 = vrot.lane.b32.xlu2 %v2424_v14, %s2319_s20  ;;  %752 = vrot.lane.b32.xlu1 %v744_v55, %s2315_s26 }
  0xb5   : > { %750 = vrot.lane.b32.xlu0 %v743_v59, %s2315_s26 }
  0xb9   : > { %v2492_v4 = vld.sshfl [vmem:[#allocation1] sm:$0xff pattern:$0x75316420]  ;;  %v2494_v5 = vld.sshfl [vmem:[#allocation1 + $0x8] sm:$0xff pattern:$0x75316420] }
  0xba   : > { %933 = vst [vmem:[#allocation1] ss:$2 sm:$0xff] %v927_v0  ;;  %v938_v7 = vld.sshfl [vmem:[#allocation1 + $0x10] sm:$0xff pattern:$0x75316420] }
  0xbb   : > { %1011 = vst [vmem:[#allocation1 + $0x10] ss:$2 sm:$0xff] %v1004_v1  ;;  %v944_v11 = vpack.c.bf16 %v938_v7, %v938_v7  ;;  %v879_v7 = vpack.c.bf16 %v2492_v4, %v2492_v4  ;;  %v2204_v4 = vld [vmem:[%s2831_s1 + $0x4] sm:$0x3] }
  0xbc   : > { %828 = vrot.lane.b32.xlu1 %v820_v2, %s2317_s28  ;;  %748 = vrot.lane.b32.xlu2 %v742_v3, %s2315_s26  ;;  %v585_v3 = vld [vmem:[%s2831_s1] sm:$0x3] }
  0xbd   : > { %826 = vrot.lane.b32.xlu0 %v819_v6, %s2317_s28  ;;  %v880_v6 = vpack.c.bf16 %v2494_v5, %v2494_v5 }
  0xc1   : > { %v936_v13 = vld.sshfl [vmem:[#allocation1] sm:$0xff pattern:$0x75316420]  ;;  %v937_v14 = vld.sshfl [vmem:[#allocation1 + $0x8] sm:$0xff pattern:$0x75316420] }
  0xc2   : > { %v943_v16 = vpack.c.bf16 %v937_v14, %v937_v14  ;;  %1009 = vst [vmem:[#allocation1] ss:$2 sm:$0xff] %v1003_v9  ;;  %v1014_v17 = vld.sshfl [vmem:[#allocation1 + $0x10] sm:$0xff pattern:$0x75316420]  ;;  %v942_v21 = vpack.c.bf16 %v936_v13, %v936_v13  ;;  %v888_v13 = vsel %vm634_vm13, %v880_v6, 0 }
  0xc3   : > { %1078 = vst [vmem:[#allocation1 + $0x10] ss:$2 sm:$0xff] %v1071_v10  ;;  %v1020_v18 = vpack.c.bf16 %v1014_v17, %v1014_v17  ;;  %v885_v14 = vsel %vm634_vm13, %v879_v7, 0 }
  0xc4   : > { %952 = vrot.lane.b32.xlu1 %v944_v11, %s2314_s25  ;;  %824 = vrot.lane.b32.xlu2 %v818_v12, %s2317_s28 }
  0xc5   : > { %950 = vrot.lane.b32.xlu0 %v943_v16, %s2314_s25 }
  0xc9   : > { %v1013_v22 = vld.sshfl [vmem:[#allocation1 + $0x8] sm:$0xff pattern:$0x75316420]  ;;  %v1012_v23 = vld.sshfl [vmem:[#allocation1] sm:$0xff pattern:$0x75316420] }
  0xca   : > { %v1019_v25 = vpack.c.bf16 %v1013_v22, %v1013_v22  ;;  %1076 = vst [vmem:[#allocation1] ss:$2 sm:$0xff] %v2442_v15  ;;  %v1081_v26 = vld.sshfl [vmem:[#allocation1 + $0x10] sm:$0xff pattern:$0x75316420]  ;;  %v1018_v28 = vpack.c.bf16 %v1012_v23, %v1012_v23 }
  0xcb   : > { %v1087_v27 = vpack.c.bf16 %v1081_v26, %v1081_v26 }
  0xcc   : > { %1028 = vrot.lane.b32.xlu1 %v1020_v18, %s2316_s27  ;;  %948 = vrot.lane.b32.xlu2 %v942_v21, %s2314_s25 }
  0xcd   : > { %1026 = vrot.lane.b32.xlu0 %v1019_v25, %s2316_s27 }
  0xd1   : > { %v1080_v30 = vld.sshfl [vmem:[#allocation1 + $0x8] sm:$0xff pattern:$0x75316420]  ;;  %v1079_v32 = vld.sshfl [vmem:[#allocation1] sm:$0xff pattern:$0x75316420] }
  0xd2   : > { %v1086_v31 = vpack.c.bf16 %v1080_v30, %v1080_v30  ;;  %v1085_v33 = vpack.c.bf16 %v1079_v32, %v1079_v32 }
  0xd4   : > { %1095 = vrot.lane.b32.xlu1 %v1087_v27, %s2320_s21  ;;  %1024 = vrot.lane.b32.xlu2 %v1018_v28, %s2316_s27  ;;  %v2207_v28 = vld [vmem:[%s2831_s1 + $0x6] sm:$0x3] }
  0xd5   : > { %1093 = vrot.lane.b32.xlu0 %v1086_v31, %s2320_s21 }
  0xdc   : > { %1091 = vrot.lane.b32.xlu2 %v1085_v33, %s2320_s21 }
  0xfe   : > { %v624_v35 = vpop.permute.xlu2 %623 }
 0x106   : > { %v673_v36 = vpop.permute.xlu2 %672 }
 0x10e   : > { %v1140_v38 = vpop.permute.xlu2 %1139 }
 0x10f   : > { %v2516_v39 = vrot.slane %v1140_v38, 4 }
 0x111   : > { %v2520_v40 = vsel %vm676_vm11, %v2516_v39, %v1140_v38  ;;  %v1147_v42 = vmul.f32 %v2516_v39, %v1138_v37  ;;  %v2210_v37 = vld [vmem:[%s2831_s1 + $0x8] sm:$0x3] }
 0x112   : > { %v1146_v43 = vmul.f32 %v2520_v40, %v2442_v15 }
 0x113   : > { %1154 = vst [vmem:[#allocation1 + $0x10] ss:$2 sm:$0xff] %v1147_v42 }
 0x114   : > { %1152 = vst [vmem:[#allocation1] ss:$2 sm:$0xff] %v1146_v43 }
 0x116   : > { %v622_v44 = vpop.permute.xlu1 %621  ;;  %v749_v63 = vpop.permute.xlu2 %748 }
 0x117   : > { %v626_v45 = vpop.permute.xlu0 %625  ;;  %v628_v46 = vsel %vm627_vm12, %v622_v44, %v624_v35 }
 0x118   : > { %v629_v47 = vsel %vm627_vm12, %v624_v35, %v626_v45  ;;  %v636_v48 = vsel %vm634_vm13, %v628_v46, 0 }
 0x119   : > { %v639_v49 = vsel %vm634_vm13, %v629_v47, 0  ;;  %648 = vmatpush.bf16.msra.mxu0 %v636_v48  ;;  %v2213_v48 = vld [vmem:[%s2831_s1 + $0xa] sm:$0x3] }
 0x11a   : > { %661 = vmatpush.bf16.msra.mxu1 %v639_v49  ;;  %v1157_v50 = vld.sshfl [vmem:[#allocation1 + $0x10] sm:$0xff pattern:$0x75316420] }
 0x11b   : > { %v1163_v53 = vpack.c.bf16 %v1157_v50, %v1157_v50  ;;  %v1156_v54 = vld.sshfl [vmem:[#allocation1 + $0x8] sm:$0xff pattern:$0x75316420]  ;;  %v1155_v55 = vld.sshfl [vmem:[#allocation1] sm:$0xff pattern:$0x75316420] }
 0x11c   : > { %v1162_v56 = vpack.c.bf16 %v1156_v54, %v1156_v54  ;;  %v1161_v57 = vpack.c.bf16 %v1155_v55, %v1155_v55  ;;  %2200 = vmatmul.msk.bf16.vlgmr.msra.gmra.mxu0 %vm630_vm14, %v2199_v51 }
 0x11d   : > { %1171 = vrot.lane.b32.xlu1 %v1163_v53, %s2313_s6  ;;  %2201 = vmatmul.msk.bf16.vlgmr.msra.gmra.mxu1 %vm630_vm14, %v2199_v51 }
 0x11e   : > { %1169 = vrot.lane.b32.xlu0 %v1162_v56, %s2313_s6  ;;  %1167 = vrot.lane.b32.xlu2 %v1161_v57, %s2313_s6  ;;  %v671_v58 = vpop.permute.xlu1 %670  ;;  %v825_v16 = vpop.permute.xlu2 %824  ;;  %v2216_v57 = vld [vmem:[%s2831_s1 + $0xc] sm:$0x3] }
 0x11f   : > { %v675_v59 = vpop.permute.xlu0 %674  ;;  %v677_v60 = vsel %vm676_vm11, %v671_v58, %v673_v36  ;;  %v2219_v58 = vld [vmem:[%s2831_s1 + $0xe] sm:$0x3] }
 0x120   : > { %v678_v0 = vsel %vm676_vm11, %v673_v36, %v675_v59  ;;  %v683_v1 = vsel %vm634_vm13, %v677_v60, 0  ;;  %v1213_v59 = vld [vmem:[%s2832_s2] sm:$0xf]  ;;  %v2321_v60 = vmov 0  }
 0x121   : > { %v686_v2 = vsel %vm634_vm13, %v678_v0, 0  ;;  %695 = vmatpush.bf16.msra.mxu2 %v683_v1  ;;  %2287 = vset.pattern.permute.xlu0 %v2321_v60 }
 0x122   : > { %708 = vmatpush.bf16.msra.mxu3 %v686_v2  ;;  %2288 = vset.pattern.permute.xlu2 %v2321_v60 }
 0x123   : > { %2289 = vset.pattern.permute.xlu1 %v2321_v60 }
 0x124   : > { %2202 = vmatmul.msk.bf16.vlgmr.msra.gmra.mxu2 %vm630_vm14, %v585_v3 }
 0x125   : > { %2203 = vmatmul.msk.bf16.vlgmr.msra.gmra.mxu3 %vm630_vm14, %v585_v3 }
 0x126   : > { %v753_v9 = vpop.permute.xlu1 %752  ;;  %v949_v27 = vpop.permute.xlu2 %948  ;;  %1216 = vperm.xlu0 %2287, %v1213_v59  }
 0x127   : > { %v751_v10 = vpop.permute.xlu0 %750 }
 0x128   : > { %v756_v11 = vsel %vm754_vm10, %v751_v10, %v753_v9  ;;  %v755_v12 = vsel %vm754_vm10, %v749_v63, %v751_v10  ;;  %v2222_v9 = vld [vmem:[%s2831_s1 + $0x10] sm:$0x3] }
 0x129   : > { %v764_v17 = vsel %vm634_vm13, %v756_v11, 0  ;;  %v761_v18 = vsel %vm634_vm13, %v755_v12, 0 }
 0x12a   : > { %786 = vmatpush.bf16.msrb.mxu1 %v764_v17  ;;  %773 = vmatpush.bf16.msrb.mxu0 %v761_v18 }
 0x12d   : > { %2206 = vmatmul.msk.bf16.vlgmr.msrb.gmra.mxu1 %vm630_vm14, %v2204_v4  ;;  %2205 = vmatmul.msk.bf16.vlgmr.msrb.gmra.mxu0 %vm630_vm14, %v2204_v4 }
 0x12e   : > { %910 = vmatpush.bf16.msra.mxu1 %v888_v13  ;;  %897 = vmatpush.bf16.msra.mxu0 %v885_v14  ;;  %v829_v5 = vpop.permute.xlu1 %828  ;;  %v1025_v38 = vpop.permute.xlu2 %1024 }
 0x12f   : > { %v827_v21 = vpop.permute.xlu0 %826 }
 0x130   : > { %v832_v22 = vsel %vm830_vm9, %v827_v21, %v829_v5  ;;  %v831_v23 = vsel %vm830_vm9, %v825_v16, %v827_v21 }
 0x131   : > { %v840_v25 = vsel %vm634_vm13, %v832_v22, 0  ;;  %v837_v26 = vsel %vm634_vm13, %v831_v23, 0 }
 0x132   : > { %862 = vmatpush.bf16.msrb.mxu3 %v840_v25  ;;  %849 = vmatpush.bf16.msrb.mxu2 %v837_v26 }
 0x135   : > { %2209 = vmatmul.msk.bf16.vlgmr.msrb.gmra.mxu3 %vm630_vm14, %v2207_v28  ;;  %2208 = vmatmul.msk.bf16.vlgmr.msrb.gmra.mxu2 %vm630_vm14, %v2207_v28 }
 0x136   : > { %v953_v30 = vpop.permute.xlu1 %952  ;;  %v1092_v49 = vpop.permute.xlu2 %1091 }
 0x137   : > { %v951_v31 = vpop.permute.xlu0 %950 }
 0x138   : > { %v956_v32 = vsel %vm799_vm8, %v951_v31, %v953_v30  ;;  %v955_v33 = vsel %vm799_vm8, %v949_v27, %v951_v31 }
 0x139   : > { %v964_v35 = vsel %vm634_vm13, %v956_v32, 0  ;;  %v961_v36 = vsel %vm634_vm13, %v955_v33, 0 }
 0x13a   : > { %986 = vmatpush.bf16.msra.mxu3 %v964_v35  ;;  %973 = vmatpush.bf16.msra.mxu2 %v961_v36 }
 0x13d   : > { %2212 = vmatmul.msk.bf16.vlgmr.msra.gmra.mxu1 %vm630_vm14, %v2210_v37  ;;  %2211 = vmatmul.msk.bf16.vlgmr.msra.gmra.mxu0 %vm630_vm14, %v2210_v37 }
 0x13e   : > { %v1029_v42 = vpop.permute.xlu1 %1028 }
 0x13f   : > { %v1027_v43 = vpop.permute.xlu0 %1026 }
 0x140   : > { %v1032_v44 = vsel %vm723_vm7, %v1027_v43, %v1029_v42  ;;  %v1031_v45 = vsel %vm723_vm7, %v1025_v38, %v1027_v43 }
 0x141   : > { %v1040_v46 = vsel %vm634_vm13, %v1032_v44, 0  ;;  %v1037_v47 = vsel %vm634_vm13, %v1031_v45, 0 }
 0x142   : > { %1062 = vmatpush.bf16.msrb.mxu1 %v1040_v46  ;;  %1049 = vmatpush.bf16.msrb.mxu0 %v1037_v47 }
 0x145   : > { %2215 = vmatmul.msk.bf16.vlgmr.msra.gmra.mxu3 %vm630_vm14, %v2213_v48  ;;  %2214 = vmatmul.msk.bf16.vlgmr.msra.gmra.mxu2 %vm630_vm14, %v2213_v48 }
 0x146   : > { %v1096_v50 = vpop.permute.xlu1 %1095 }
 0x147   : > { %v1094_v51 = vpop.permute.xlu0 %1093 }
 0x148   : > { %v1099_v53 = vsel %vm1097_vm15, %v1094_v51, %v1096_v50  ;;  %v1098_v54 = vsel %vm1097_vm15, %v1092_v49, %v1094_v51 }
 0x149   : > { %v1107_v55 = vsel %vm634_vm13, %v1099_v53, 0  ;;  %v1104_v56 = vsel %vm634_vm13, %v1098_v54, 0 }
 0x14a   : > { %1129 = vmatpush.bf16.msrb.mxu3 %v1107_v55  ;;  %1116 = vmatpush.bf16.msrb.mxu2 %v1104_v56 }
 0x14d   : > { %2218 = vmatmul.msk.bf16.vlgmr.msrb.gmra.mxu1 %vm630_vm14, %v2216_v57  ;;  %2217 = vmatmul.msk.bf16.vlgmr.msrb.gmra.mxu0 %vm630_vm14, %v2216_v57 }
 0x155   : > { %2221 = vmatmul.msk.bf16.vlgmr.msrb.gmra.mxu3 %vm630_vm14, %v2219_v58  ;;  %2220 = vmatmul.msk.bf16.vlgmr.msrb.gmra.mxu2 %vm630_vm14, %v2219_v58 }
 0x178   : > { %v1168_v0 = vpop.permute.xlu2 %1167 }
 0x18f   : > { %v1172_v63 = vpop.permute.xlu1 %1171 }
 0x190   : > { %v1170_v1 = vpop.permute.xlu0 %1169 }
 0x191   : > { %v1174_v2 = vsel %vm579_vm6, %v1168_v0, %v1170_v1  ;;  %v1175_v3 = vsel %vm579_vm6, %v1170_v1, %v1172_v63 }
 0x192   : > { %v1180_v6 = vsel %vm634_vm13, %v1174_v2, 0  ;;  %v1183_v7 = vsel %vm634_vm13, %v1175_v3, 0 }
 0x193   : > { %1192 = vmatpush.bf16.msra.mxu0 %v1180_v6  ;;  %1205 = vmatpush.bf16.msra.mxu1 %v1183_v7 }
 0x196   : > { %2223 = vmatmul.msk.bf16.vlgmr.msra.gmra.mxu0 %vm630_vm14, %v2222_v9  ;;  %2224 = vmatmul.msk.bf16.vlgmr.msra.gmra.mxu1 %vm630_vm14, %v2222_v9 }
 0x198   : > { %v1217_v3 = vpop.permute.xlu0 %1216 }
 0x199   : > { %v650_v10 = vpop.f32.mrf.mxu0 }
 0x19a   : > { %v663_v11 = vpop.f32.mrf.mxu1 }
 0x1a1   : > { %v652_v12 = vpop.f32.mrf.mxu0 }
 0x1a2   : > { %v665_v13 = vpop.f32.mrf.mxu1 }
 0x1a7   : > { %v697_v14 = vpop.f32.mrf.mxu2 }
 0x1a8   : > { %v710_v16 = vpop.f32.mrf.mxu3  ;;  %v698_v17 = vadd.f32 %v697_v14, %v650_v10 }
 0x1a9   : > { %v711_v18 = vadd.f32 %v710_v16, %v663_v11 }
 0x1aa   : > { %v788_v4 = vpop.f32.mrf.mxu1  ;;  %v775_v5 = vpop.f32.mrf.mxu0 }
 0x1ab   : > { %v793_v21 = vadd.f32 %v788_v4, %v711_v18  ;;  %v792_v22 = vadd.f32 %v775_v5, %v698_v17 }
 0x1af   : > { %v699_v23 = vpop.f32.mrf.mxu2 }
 0x1b0   : > { %v712_v25 = vpop.f32.mrf.mxu3 }
 0x1b2   : > { %v790_v26 = vpop.f32.mrf.mxu1  ;;  %v777_v27 = vpop.f32.mrf.mxu0 }
 0x1b8   : > { %v864_v28 = vpop.f32.mrf.mxu3  ;;  %v851_v30 = vpop.f32.mrf.mxu2 }
 0x1b9   : > { %v869_v31 = vadd.f32 %v864_v28, %v793_v21  ;;  %v868_v32 = vadd.f32 %v851_v30, %v792_v22 }
 0x1ba   : > { %v912_v33 = vpop.f32.mrf.mxu1  ;;  %v899_v35 = vpop.f32.mrf.mxu0 }
 0x1bb   : > { %v917_v36 = vadd.f32 %v912_v33, %v869_v31  ;;  %v916_v37 = vadd.f32 %v899_v35, %v868_v32 }
 0x1c0   : > { %v866_v38 = vpop.f32.mrf.mxu3  ;;  %v853_v42 = vpop.f32.mrf.mxu2 }
 0x1c2   : > { %v914_v43 = vpop.f32.mrf.mxu1  ;;  %v901_v44 = vpop.f32.mrf.mxu0 }
 0x1c8   : > { %v988_v45 = vpop.f32.mrf.mxu3  ;;  %v975_v46 = vpop.f32.mrf.mxu2 }
 0x1c9   : > { %v993_v47 = vadd.f32 %v988_v45, %v917_v36  ;;  %v992_v48 = vadd.f32 %v975_v46, %v916_v37 }
 0x1ca   : > { %v1064_v49 = vpop.f32.mrf.mxu1  ;;  %v1051_v50 = vpop.f32.mrf.mxu0 }
 0x1cb   : > { %v1069_v51 = vadd.f32 %v1064_v49, %v993_v47  ;;  %v1068_v53 = vadd.f32 %v1051_v50, %v992_v48  ;;  %v1543_v47 = vld [vmem:[#allocation2 + $0xc] sm:$0xf] }
 0x1cc   : > { %v1545_v48 = vmul.f32 %v1543_v47, %v2472_v52 }
 0x1d0   : > { %v990_v54 = vpop.f32.mrf.mxu3  ;;  %v977_v55 = vpop.f32.mrf.mxu2 }
 0x1d1   : > { %v1611_v54 = vld [vmem:[#allocation2 + $0xc] sm:$0xf] }
 0x1d2   : > { %v1066_v56 = vpop.f32.mrf.mxu1  ;;  %v1053_v57 = vpop.f32.mrf.mxu0  ;;  %v1613_v52 = vmul.f32 %v1611_v54, %v2483_v62 }
 0x1d8   : > { %v1131_v58 = vpop.f32.mrf.mxu3  ;;  %v1118_v59 = vpop.f32.mrf.mxu2 }
 0x1d9   : > { %v1136_v1 = vadd.f32 %v1131_v58, %v1069_v51  ;;  %v1135_v2 = vadd.f32 %v1118_v59, %v1068_v53 }
 0x1e0   : > { %v1133_v63 = vpop.f32.mrf.mxu3  ;;  %v1120_v0 = vpop.f32.mrf.mxu2 }
 0x213   : > { %v1194_v6 = vpop.f32.mrf.mxu0  ;;  %v1207_v7 = vpop.f32.mrf.mxu1 }
 0x214   : > { %v1211_v9 = vadd.f32 %v1194_v6, %v1135_v2  ;;  %v1212_v10 = vadd.f32 %v1207_v7, %v1136_v1  ;;  %v1679_v1 = vld [vmem:[#allocation2 + $0xc] sm:$0xf] }
 0x215   : > { %v1745_v7 = vld [vmem:[#allocation2 + $0xc] sm:$0xf] }
 0x216   : > { %v1219_v11 = vadd.f32 %v1217_v3, %v1211_v9  ;;  %v1220_v12 = vadd.f32 %v1217_v3, %v1212_v10  ;;  %v1747_v9 = vmul.f32 %v1745_v7, %v2516_v39 }
 0x218   : > { %v1222_v13 = vmax.f32 %v1220_v12, 0.0  ;;  %v1221_v14 = vmax.f32 %v1219_v11, 0.0 }
 0x21a   : > { %v1225_v16 = vrot.slane %v1222_v13, 4 }
 0x21b   : > { %v1196_v17 = vpop.f32.mrf.mxu0  ;;  %v1209_v18 = vpop.f32.mrf.mxu1 }
 0x21c   : > { %v2618_v4 = vsel %vm574_vm4, %v1221_v14, %v1225_v16 }
 0x21d   : > { %1228 = vst [vmem:[#allocation2 + $0x4] sm:$0xff] %v2618_v4  ;;  %v1544_v55 = vmul.f32 %v2618_v4, %v2481_v61  ;;  %v1612_v61 = vmul.f32 %v2618_v4, %v2498_v8  ;;  %v1746_v8 = vmul.f32 %v2618_v4, %v2520_v40 }
 0x224   : > { %v1229_v5 = vld [vmem:[#allocation2] sm:$0xff]  ;;  %v1230_v21 = vld [vmem:[#allocation2 + $0x8] sm:$0xf] }
 0x225   : > { %v1231_v22 = vmul.f32 %v1229_v5, %v2449_v20  ;;  %v1232_v23 = vmul.f32 %v1230_v21, %v2445_v19  ;;  %v1249_v25 = vld [vmem:[#allocation2 + $0x8] sm:$0xf]  ;;  %v1360_v31 = vmul.f32 %v1229_v5, %v2457_v29  ;;  %v1428_v38 = vmul.f32 %v1229_v5, %v2465_v41 }
 0x226   : > { %v1359_v30 = vld [vmem:[#allocation2 + $0x8] sm:$0xf] }
 0x227   : > { %1236 = vst [vmem:[#allocation1] ss:$2 sm:$0xff] %v1231_v22  ;;  %v1361_v32 = vmul.f32 %v1359_v30, %v2453_v24  ;;  %v1427_v19 = vld [vmem:[#allocation2 + $0x8] sm:$0xf] }
 0x228   : > { %1238 = vst [vmem:[#allocation1 + $0x10] ss:$2 sm:$0xff] %v1232_v23  ;;  %v1429_v42 = vmul.f32 %v1427_v19, %v2461_v34 }
 0x22e   : > { %v1239_v26 = vld.sshfl [vmem:[#allocation1] sm:$0xff pattern:$0x75316420]  ;;  %v1240_v27 = vld.sshfl [vmem:[#allocation1 + $0x8] sm:$0xff pattern:$0x75316420] }
 0x22f   : > { %1254 = vst [vmem:[#allocation1] ss:$2 sm:$0xff] %v1229_v5  ;;  %v1241_v28 = vld.sshfl [vmem:[#allocation1 + $0x10] sm:$0xff pattern:$0x75316420]  ;;  %v1246_v34 = vpack.c.bf16 %v1240_v27, %v1240_v27  ;;  %v1245_v50 = vpack.c.bf16 %v1239_v26, %v1239_v26 }
 0x230   : > { %1256 = vst [vmem:[#allocation1 + $0x10] ss:$2 sm:$0xff] %v1249_v25  ;;  %v1247_v0 = vpack.c.bf16 %v1241_v28, %v1241_v28 }
 0x236   : > { %v1258_v33 = vld.sshfl [vmem:[#allocation1 + $0x8] sm:$0xff pattern:$0x75316420]  ;;  %v1257_v35 = vld.sshfl [vmem:[#allocation1] sm:$0xff pattern:$0x75316420] }
 0x237   : > { %v1264_v36 = vpack.c.bf16 %v1258_v33, %v1258_v33  ;;  %v1263_v37 = vpack.c.bf16 %v1257_v35, %v1257_v35  ;;  %1366 = vst [vmem:[#allocation1] ss:$2 sm:$0xff] %v1360_v31  ;;  %v1259_v20 = vld.sshfl [vmem:[#allocation1 + $0x10] sm:$0xff pattern:$0x75316420] }
 0x238   : > { %1368 = vst [vmem:[#allocation1 + $0x10] ss:$2 sm:$0xff] %v1361_v32  ;;  %v1265_v46 = vpack.c.bf16 %v1259_v20, %v1259_v20 }
 0x239   : > { %1271 = vrot.lane.b32.xlu2 %v1264_v36, %s2318_s19  ;;  %1269 = vrot.lane.b32.xlu1 %v1263_v37, %s2318_s19  ;;  %v2225_v36 = vld [vmem:[%s2833_s3 + $0x2] sm:$0x3] }
 0x23e   : > { %v1370_v43 = vld.sshfl [vmem:[#allocation1 + $0x8] sm:$0xff pattern:$0x75316420]  ;;  %v1369_v29 = vld.sshfl [vmem:[#allocation1] sm:$0xff pattern:$0x75316420] }
 0x23f   : > { %v1376_v44 = vpack.c.bf16 %v1370_v43, %v1370_v43  ;;  %v1375_v24 = vpack.c.bf16 %v1369_v29, %v1369_v29  ;;  %1434 = vst [vmem:[#allocation1] ss:$2 sm:$0xff] %v1428_v38  ;;  %v1371_v45 = vld.sshfl [vmem:[#allocation1 + $0x10] sm:$0xff pattern:$0x75316420] }
 0x240   : > { %1436 = vst [vmem:[#allocation1 + $0x10] ss:$2 sm:$0xff] %v1429_v42  ;;  %v1377_v53 = vpack.c.bf16 %v1371_v45, %v1371_v45 }
 0x241   : > { %1383 = vrot.lane.b32.xlu0 %v1376_v44, %s2315_s26  ;;  %1381 = vrot.lane.b32.xlu2 %v1375_v24, %s2315_s26 }
 0x242   : > { %1273 = vrot.lane.b32.xlu1 %v1265_v46, %s2318_s19 }
 0x246   : > { %v1438_v41 = vld.sshfl [vmem:[#allocation1 + $0x8] sm:$0xff pattern:$0x75316420]  ;;  %v1437_v49 = vld.sshfl [vmem:[#allocation1] sm:$0xff pattern:$0x75316420] }
 0x247   : > { %1498 = vst [vmem:[#allocation1] ss:$2 sm:$0xff] %v2618_v4  ;;  %v1439_v51 = vld.sshfl [vmem:[#allocation1 + $0x10] sm:$0xff pattern:$0x75316420]  ;;  %v1444_v58 = vpack.c.bf16 %v1438_v41, %v1438_v41  ;;  %v1443_v59 = vpack.c.bf16 %v1437_v49, %v1437_v49 }
 0x248   : > { %1552 = vst [vmem:[#allocation1 + $0x10] ss:$2 sm:$0xff] %v1545_v48  ;;  %v1445_v6 = vpack.c.bf16 %v1439_v51, %v1439_v51  ;;  %v1233_v51 = vld [vmem:[%s2833_s3] sm:$0x3] }
 0x249   : > { %1317 = vrot.lane.b32.xlu0 %v1246_v34, %s2319_s20  ;;  %1315 = vrot.lane.b32.xlu2 %v1245_v50, %s2319_s20 }
 0x24a   : > { %1385 = vrot.lane.b32.xlu1 %v1377_v53, %s2315_s26  ;;  %v2230_v53 = vld [vmem:[%s2833_s3 + $0x4] sm:$0x3]  ;;  %s523_s26 = scalar_lea.vmem %s2846_s16, %s2850_s29 }
 0x24e   : > { %v2640_v56 = vld.sshfl [vmem:[#allocation1] sm:$0xff pattern:$0x75316420]  ;;  %v2642_v57 = vld.sshfl [vmem:[#allocation1 + $0x8] sm:$0xff pattern:$0x75316420] }
 0x24f   : > { %1550 = vst [vmem:[#allocation1] ss:$2 sm:$0xff] %v1544_v55  ;;  %v1555_v63 = vld.sshfl [vmem:[#allocation1 + $0x10] sm:$0xff pattern:$0x75316420]  ;;  %v1503_v20 = vpack.c.bf16 %v2640_v56, %v2640_v56  ;;  %v1504_v47 = vpack.c.bf16 %v2642_v57, %v2642_v57 }
 0x250   : > { %1620 = vst [vmem:[#allocation1 + $0x10] ss:$2 sm:$0xff] %v1613_v52  ;;  %v1561_v21 = vpack.c.bf16 %v1555_v63, %v1555_v63 }
 0x251   : > { %1451 = vrot.lane.b32.xlu0 %v1444_v58, %s2317_s28  ;;  %1449 = vrot.lane.b32.xlu2 %v1443_v59, %s2317_s28  ;;  %v1509_v24 = vsel %vm634_vm13, %v1503_v20, 0  ;;  %v1512_v54 = vsel %vm634_vm13, %v1504_v47, 0 }
 0x252   : > { %1319 = vrot.lane.b32.xlu1 %v1247_v0, %s2319_s20 }
 0x256   : > { %v1553_v62 = vld.sshfl [vmem:[#allocation1] sm:$0xff pattern:$0x75316420]  ;;  %v1554_v2 = vld.sshfl [vmem:[#allocation1 + $0x8] sm:$0xff pattern:$0x75316420] }
 0x257   : > { %1618 = vst [vmem:[#allocation1] ss:$2 sm:$0xff] %v1612_v61  ;;  %v1623_v3 = vld.sshfl [vmem:[#allocation1 + $0x10] sm:$0xff pattern:$0x75316420]  ;;  %v1560_v18 = vpack.c.bf16 %v1554_v2, %v1554_v2  ;;  %v1559_v5 = vpack.c.bf16 %v1553_v62, %v1553_v62 }
 0x258   : > { %1686 = vst [vmem:[#allocation1 + $0x10] ss:$2 sm:$0xff] %v1679_v1  ;;  %v1629_v16 = vpack.c.bf16 %v1623_v3, %v1623_v3  ;;  %v2233_v2 = vld [vmem:[%s2833_s3 + $0x6] sm:$0x3]  ;;  %v2236_v3 = vld [vmem:[%s2833_s3 + $0x8] sm:$0x3] }
 0x25a   : > { %1453 = vrot.lane.b32.xlu1 %v1445_v6, %s2317_s28 }
 0x25e   : > { %v1622_v10 = vld.sshfl [vmem:[#allocation1 + $0x8] sm:$0xff pattern:$0x75316420]  ;;  %v1621_v11 = vld.sshfl [vmem:[#allocation1] sm:$0xff pattern:$0x75316420] }
 0x25f   : > { %v1628_v12 = vpack.c.bf16 %v1622_v10, %v1622_v10  ;;  %v1689_v13 = vld.sshfl [vmem:[#allocation1 + $0x10] sm:$0xff pattern:$0x75316420]  ;;  %v1627_v14 = vpack.c.bf16 %v1621_v11, %v1621_v11  ;;  %1684 = vst [vmem:[#allocation1] ss:$2 sm:$0xff] %v2618_v4 }
 0x260   : > { %1754 = vst [vmem:[#allocation1 + $0x10] ss:$2 sm:$0xff] %v1747_v9  ;;  %v1695_v40 = vpack.c.bf16 %v1689_v13, %v1689_v13 }
 0x261   : > { %1635 = vrot.lane.b32.xlu0 %v1628_v12, %s2316_s27  ;;  %1633 = vrot.lane.b32.xlu2 %v1627_v14, %s2316_s27  ;;  %v1812_v14 = vld [vmem:[%s2834_s4] sm:$0xf] }
 0x262   : > { %1637 = vrot.lane.b32.xlu1 %v1629_v16, %s2316_s27 }
 0x266   : > { %v1687_v17 = vld.sshfl [vmem:[#allocation1] sm:$0xff pattern:$0x75316420]  ;;  %v1688_v39 = vld.sshfl [vmem:[#allocation1 + $0x8] sm:$0xff pattern:$0x75316420] }
 0x267   : > { %1752 = vst [vmem:[#allocation1] ss:$2 sm:$0xff] %v1746_v8  ;;  %v1757_v22 = vld.sshfl [vmem:[#allocation1 + $0x10] sm:$0xff pattern:$0x75316420]  ;;  %v1694_v4 = vpack.c.bf16 %v1688_v39, %v1688_v39  ;;  %v1693_v30 = vpack.c.bf16 %v1687_v17, %v1687_v17 }
 0x268   : > { %v1763_v28 = vpack.c.bf16 %v1757_v22, %v1757_v22  ;;  %v2242_v22 = vld [vmem:[%s2833_s3 + $0xc] sm:$0x3] }
 0x269   : > { %1567 = vrot.lane.b32.xlu0 %v1560_v18, %s2314_s25  ;;  %1565 = vrot.lane.b32.xlu2 %v1559_v5, %s2314_s25 }
 0x26a   : > { %1569 = vrot.lane.b32.xlu1 %v1561_v21, %s2314_s25  ;;  %v2239_v21 = vld [vmem:[%s2833_s3 + $0xa] sm:$0x3] }
 0x26e   : > { %v1756_v23 = vld.sshfl [vmem:[#allocation1 + $0x8] sm:$0xff pattern:$0x75316420]  ;;  %v1755_v25 = vld.sshfl [vmem:[#allocation1] sm:$0xff pattern:$0x75316420] }
 0x26f   : > { %v1762_v26 = vpack.c.bf16 %v1756_v23, %v1756_v23  ;;  %v1761_v27 = vpack.c.bf16 %v1755_v25, %v1755_v25  ;;  %v1949_v23 = vld [vmem:[%s2842_s12] sm:$0xf] }
 0x271   : > { %1769 = vrot.lane.b32.xlu0 %v1762_v26, %s2313_s6  ;;  %1767 = vrot.lane.b32.xlu2 %v1761_v27, %s2313_s6 }
 0x272   : > { %1771 = vrot.lane.b32.xlu1 %v1763_v28, %s2313_s6 }
 0x279   : > { %1701 = vrot.lane.b32.xlu0 %v1694_v4, %s2320_s21  ;;  %1699 = vrot.lane.b32.xlu2 %v1693_v30, %s2320_s21 }
 0x27a   : > { %1703 = vrot.lane.b32.xlu1 %v1695_v40, %s2320_s21 }
 0x281   : > { %1815 = vperm.xlu2 %2288, %v1812_v14  }
 0x289   : > { %1952 = vperm.xlu2 %2288, %v1949_v23  }
 0x293   : > { %v1272_v31 = vpop.permute.xlu2 %1271 }
 0x29b   : > { %v1382_v37 = vpop.permute.xlu2 %1381 }
 0x2a3   : > { %v1316_v45 = vpop.permute.xlu2 %1315 }
 0x2ab   : > { %v1270_v32 = vpop.permute.xlu1 %1269  ;;  %v1450_v55 = vpop.permute.xlu2 %1449 }
 0x2ac   : > { %v1275_v33 = vsel %vm627_vm12, %v1270_v32, %v1272_v31 }
 0x2ad   : > { %v1281_v35 = vsel %vm634_vm13, %v1275_v33, 0 }
 0x2ae   : > { %1293 = vmatpush.bf16.msra.mxu2 %v1281_v35 }
 0x2b1   : > { %2226 = vmatmul.msk.bf16.vlgmr.msra.gmra.mxu2 %vm630_vm14, %v2225_v36 }
 0x2b3   : > { %v1384_v19 = vpop.permute.xlu0 %1383 }
 0x2b4   : > { %v1387_v38 = vsel %vm754_vm10, %v1382_v37, %v1384_v19  ;;  %v1274_v42 = vpop.permute.xlu1 %1273 }
 0x2b5   : > { %v1393_v43 = vsel %vm634_vm13, %v1387_v38, 0  ;;  %v1276_v29 = vsel %vm627_vm12, %v1272_v31, %v1274_v42  ;;  %v2116_v31 = vld [vmem:[%s2845_s15] sm:$0xf]  ;;  %v2245_v38 = vld [vmem:[%s2833_s3 + $0xe] sm:$0x3] }
 0x2b6   : > { %v1284_v44 = vsel %vm634_vm13, %v1276_v29, 0  ;;  %1405 = vmatpush.bf16.msrb.mxu2 %v1393_v43  ;;  %2119 = vperm.xlu2 %2288, %v2116_v31   ;;  %v2248_v42 = vld [vmem:[%s2833_s3 + $0x10] sm:$0x3] }
 0x2b7   : > { %1306 = vmatpush.bf16.msra.mxu3 %v1284_v44 }
 0x2ba   : > { %1521 = vmatpush.bf16.msra.mxu2 %v1509_v24  ;;  %2227 = vmatmul.msk.bf16.vlgmr.msra.gmra.mxu3 %vm630_vm14, %v2225_v36 }
 0x2bb   : > { %v1318_v46 = vpop.permute.xlu0 %1317  ;;  %v1634_v1 = vpop.permute.xlu2 %1633 }
 0x2bc   : > { %v1321_v48 = vsel %vm676_vm11, %v1316_v45, %v1318_v46  ;;  %v1386_v41 = vpop.permute.xlu1 %1385 }
 0x2bd   : > { %v1327_v49 = vsel %vm634_vm13, %v1321_v48, 0  ;;  %v1388_v34 = vsel %vm754_vm10, %v1384_v19, %v1386_v41 }
 0x2be   : > { %v1396_v50 = vsel %vm634_vm13, %v1388_v34, 0  ;;  %1339 = vmatpush.bf16.msrb.mxu0 %v1327_v49 }
 0x2bf   : > { %1418 = vmatpush.bf16.msrb.mxu3 %v1396_v50 }
 0x2c1   : > { %2228 = vmatmul.msk.bf16.vlgmr.msrb.gmra.mxu0 %vm630_vm14, %v1233_v51  ;;  %2231 = vmatmul.msk.bf16.vlgmr.msrb.gmra.mxu2 %vm630_vm14, %v2230_v53 }
 0x2c3   : > { %1534 = vmatpush.bf16.msra.mxu3 %v1512_v54  ;;  %v1452_v52 = vpop.permute.xlu0 %1451  ;;  %v1566_v13 = vpop.permute.xlu2 %1565 }
 0x2c4   : > { %v1455_v56 = vsel %vm830_vm9, %v1450_v55, %v1452_v52  ;;  %v1320_v57 = vpop.permute.xlu1 %1319 }
 0x2c5   : > { %v1461_v58 = vsel %vm634_vm13, %v1455_v56, 0  ;;  %v1322_v59 = vsel %vm676_vm11, %v1318_v46, %v1320_v57 }
 0x2c6   : > { %v1330_v63 = vsel %vm634_vm13, %v1322_v59, 0  ;;  %1473 = vmatpush.bf16.msra.mxu0 %v1461_v58 }
 0x2c7   : > { %1352 = vmatpush.bf16.msrb.mxu1 %v1330_v63 }
 0x2ca   : > { %2229 = vmatmul.msk.bf16.vlgmr.msrb.gmra.mxu1 %vm630_vm14, %v1233_v51  ;;  %2232 = vmatmul.msk.bf16.vlgmr.msrb.gmra.mxu3 %vm630_vm14, %v2230_v53 }
 0x2cb   : > { %v1768_v25 = vpop.permute.xlu2 %1767 }
 0x2cc   : > { %v1454_v0 = vpop.permute.xlu1 %1453 }
 0x2cd   : > { %v1456_v61 = vsel %vm830_vm9, %v1452_v52, %v1454_v0  ;;  %v1903_v0 = vld [vmem:[%s2840_s10] sm:$0xff] }
 0x2ce   : > { %v1464_v62 = vsel %vm634_vm13, %v1456_v61, 0  ;;  %1906 = vperm.xlu1 %2289, %v1903_v0  }
 0x2cf   : > { %1486 = vmatpush.bf16.msra.mxu1 %v1464_v62 }
 0x2d1   : > { %2234 = vmatmul.msk.bf16.vlgmr.msra.gmra.mxu0 %vm630_vm14, %v2233_v2  ;;  %2237 = vmatmul.msk.bf16.vlgmr.msra.gmra.mxu2 %vm630_vm14, %v2236_v3 }
 0x2d3   : > { %v1636_v6 = vpop.permute.xlu0 %1635  ;;  %v1700_v32 = vpop.permute.xlu2 %1699 }
 0x2d4   : > { %v1639_v7 = vsel %vm723_vm7, %v1634_v1, %v1636_v6  ;;  %v1638_v9 = vpop.permute.xlu1 %1637 }
 0x2d5   : > { %v1645_v10 = vsel %vm634_vm13, %v1639_v7, 0  ;;  %v1640_v11 = vsel %vm723_vm7, %v1636_v6, %v1638_v9 }
 0x2d6   : > { %v1648_v12 = vsel %vm634_vm13, %v1640_v11, 0  ;;  %1657 = vmatpush.bf16.msrb.mxu2 %v1645_v10 }
 0x2d7   : > { %1670 = vmatpush.bf16.msrb.mxu3 %v1648_v12 }
 0x2da   : > { %2235 = vmatmul.msk.bf16.vlgmr.msra.gmra.mxu1 %vm630_vm14, %v2233_v2  ;;  %2238 = vmatmul.msk.bf16.vlgmr.msra.gmra.mxu3 %vm630_vm14, %v2236_v3 }
 0x2db   : > { %v1568_v16 = vpop.permute.xlu0 %1567 }
 0x2dc   : > { %v1571_v8 = vsel %vm799_vm8, %v1566_v13, %v1568_v16  ;;  %v1570_v17 = vpop.permute.xlu1 %1569 }
 0x2dd   : > { %v1577_v39 = vsel %vm634_vm13, %v1571_v8, 0  ;;  %v1572_v18 = vsel %vm799_vm8, %v1568_v16, %v1570_v17 }
 0x2de   : > { %v1580_v5 = vsel %vm634_vm13, %v1572_v18, 0  ;;  %1589 = vmatpush.bf16.msrb.mxu0 %v1577_v39 }
 0x2df   : > { %1602 = vmatpush.bf16.msrb.mxu1 %v1580_v5 }
 0x2e1   : > { %2240 = vmatmul.msk.bf16.vlgmr.msrb.gmra.mxu0 %vm630_vm14, %v2239_v21  ;;  %2243 = vmatmul.msk.bf16.vlgmr.msrb.gmra.mxu2 %vm630_vm14, %v2242_v22 }
 0x2e3   : > { %v1770_v26 = vpop.permute.xlu0 %1769 }
 0x2e4   : > { %v1773_v27 = vsel %vm579_vm6, %v1768_v25, %v1770_v26  ;;  %v1772_v28 = vpop.permute.xlu1 %1771 }
 0x2e5   : > { %v1779_v40 = vsel %vm634_vm13, %v1773_v27, 0  ;;  %v1774_v4 = vsel %vm579_vm6, %v1770_v26, %v1772_v28 }
 0x2e6   : > { %v1782_v30 = vsel %vm634_vm13, %v1774_v4, 0  ;;  %1791 = vmatpush.bf16.msra.mxu2 %v1779_v40 }
 0x2e7   : > { %1804 = vmatpush.bf16.msra.mxu3 %v1782_v30 }
 0x2ea   : > { %2241 = vmatmul.msk.bf16.vlgmr.msrb.gmra.mxu1 %vm630_vm14, %v2239_v21  ;;  %2244 = vmatmul.msk.bf16.vlgmr.msrb.gmra.mxu3 %vm630_vm14, %v2242_v22  ;;  %v1816_v22 = vpop.permute.xlu2 %1815 }
 0x2eb   : > { %v1702_v33 = vpop.permute.xlu0 %1701 }
 0x2ec   : > { %v1705_v35 = vsel %vm1097_vm15, %v1700_v32, %v1702_v33  ;;  %v1704_v36 = vpop.permute.xlu1 %1703  ;;  %v1902_v32 = vld [vmem:[%s2839_s9] sm:$0xf] }
 0x2ed   : > { %v1711_v37 = vsel %vm634_vm13, %v1705_v35, 0  ;;  %v1706_v20 = vsel %vm1097_vm15, %v1702_v33, %v1704_v36 }
 0x2ee   : > { %v1714_v19 = vsel %vm634_vm13, %v1706_v20, 0  ;;  %1723 = vmatpush.bf16.msra.mxu0 %v1711_v37 }
 0x2ef   : > { %1736 = vmatpush.bf16.msra.mxu1 %v1714_v19 }
 0x2f1   : > { %2246 = vmatmul.msk.bf16.vlgmr.msra.gmra.mxu0 %vm630_vm14, %v2245_v38  ;;  %2249 = vmatmul.msk.bf16.vlgmr.msra.gmra.mxu2 %vm630_vm14, %v2248_v42 }
 0x2fa   : > { %2247 = vmatmul.msk.bf16.vlgmr.msra.gmra.mxu1 %vm630_vm14, %v2245_v38  ;;  %2250 = vmatmul.msk.bf16.vlgmr.msra.gmra.mxu3 %vm630_vm14, %v2248_v42 }
 0x334   : > { %v1295_v43 = vpop.f32.mrf.mxu2 }
 0x33c   : > { %v1297_v29 = vpop.f32.mrf.mxu2 }
 0x33d   : > { %v1308_v44 = vpop.f32.mrf.mxu3 }
 0x33e   : > { %v1341_v24 = vpop.f32.mrf.mxu0 }
 0x33f   : > { %v1342_v61 = vadd.f32 %v1341_v24, %v1295_v43 }
 0x344   : > { %v1407_v45 = vpop.f32.mrf.mxu2 }
 0x345   : > { %v1310_v46 = vpop.f32.mrf.mxu3  ;;  %v1424_v2 = vadd.f32 %v1407_v45, %v1342_v61 }
 0x346   : > { %v1343_v47 = vpop.f32.mrf.mxu0 }
 0x347   : > { %v1354_v48 = vpop.f32.mrf.mxu1 }
 0x348   : > { %v1355_v13 = vadd.f32 %v1354_v48, %v1308_v44  ;;  %v2322_v44 = vmov 256.0  }
 0x349   : > { %2290 = vrcp.f32 %v2322_v44 }
 0x34c   : > { %v1409_v41 = vpop.f32.mrf.mxu2 }
 0x34d   : > { %v1420_v49 = vpop.f32.mrf.mxu3 }
 0x34e   : > { %v1475_v34 = vpop.f32.mrf.mxu0  ;;  %v1425_v16 = vadd.f32 %v1420_v49, %v1355_v13 }
 0x34f   : > { %v1356_v50 = vpop.f32.mrf.mxu1  ;;  %v1492_v3 = vadd.f32 %v1475_v34, %v1424_v2  ;;  %v2291_v24 = vpop.eup %2290 }
 0x350   : > { %v1828_v45 = vmul.f32 256.0, %v2291_v24  ;;  %vm1832_vm0 = vweird.f32 %v2291_v24 }
 0x352   : > { %v1829_v46 = vsub.f32 1.0, %v1828_v45 }
 0x354   : > { %v1523_v51 = vpop.f32.mrf.mxu2  ;;  %v1830_v47 = vmul.f32 %v2291_v24, %v1829_v46 }
 0x355   : > { %v1422_v53 = vpop.f32.mrf.mxu3  ;;  %v1540_v7 = vadd.f32 %v1523_v51, %v1492_v3 }
 0x356   : > { %v1477_v54 = vpop.f32.mrf.mxu0  ;;  %v1831_v48 = vadd.f32 %v2291_v24, %v1830_v47  ;;  %v1835_v53 = vld [vmem:[%s2835_s5] sm:$0x1] }
 0x357   : > { %v1488_v55 = vpop.f32.mrf.mxu1  ;;  %v1907_v54 = vpop.permute.xlu1 %1906 }
 0x358   : > { %v1493_v17 = vadd.f32 %v1488_v55, %v1425_v16  ;;  %v1833_v41 = vsel %vm1832_vm0, %v2291_v24, %v1831_v48  ;;  %v1858_v16 = vld [vmem:[%s2837_s7] sm:$0x3] }
 0x35c   : > { %v1525_v52 = vpop.f32.mrf.mxu2 }
 0x35d   : > { %v1536_v56 = vpop.f32.mrf.mxu3 }
 0x35e   : > { %v1591_v57 = vpop.f32.mrf.mxu0  ;;  %v1541_v21 = vadd.f32 %v1536_v56, %v1493_v17 }
 0x35f   : > { %v1490_v58 = vpop.f32.mrf.mxu1  ;;  %v1608_v11 = vadd.f32 %v1591_v57, %v1540_v7 }
 0x364   : > { %v1659_v59 = vpop.f32.mrf.mxu2 }
 0x365   : > { %v1538_v63 = vpop.f32.mrf.mxu3  ;;  %v1676_v14 = vadd.f32 %v1659_v59, %v1608_v11 }
 0x366   : > { %v1593_v1 = vpop.f32.mrf.mxu0  ;;  %v1946_v63 = vld [vmem:[%s2841_s11] sm:$0x3] }
 0x367   : > { %v1604_v62 = vpop.f32.mrf.mxu1 }
 0x368   : > { %v1609_v27 = vadd.f32 %v1604_v62, %v1541_v21  ;;  %v1837_v62 = vld [vmem:[#allocation3] sm:$0x1] }
 0x36c   : > { %v1661_v6 = vpop.f32.mrf.mxu2 }
 0x36d   : > { %v1672_v9 = vpop.f32.mrf.mxu3 }
 0x36e   : > { %v1725_v10 = vpop.f32.mrf.mxu0  ;;  %v1677_v40 = vadd.f32 %v1672_v9, %v1609_v27 }
 0x36f   : > { %v1606_v12 = vpop.f32.mrf.mxu1  ;;  %v1742_v8 = vadd.f32 %v1725_v10, %v1676_v14  ;;  %v1866_v10 = vsel %vm1864_vm2, 65535, %v2321_v60 }
 0x374   : > { %v1793_v39 = vpop.f32.mrf.mxu2 }
 0x375   : > { %v1674_v18 = vpop.f32.mrf.mxu3  ;;  %v1810_v5 = vadd.f32 %v1793_v39, %v1742_v8  ;;  %v1953_v8 = vpop.permute.xlu2 %1952 }
 0x376   : > { %v1727_v23 = vpop.f32.mrf.mxu0 }
 0x377   : > { %v2761_v25 = vadd.f32 %v1816_v22, %v1810_v5  ;;  %v1738_v26 = vpop.f32.mrf.mxu1 }
 0x378   : > { %v1743_v30 = vadd.f32 %v1738_v26, %v1677_v40 }
 0x379   : > { %v1820_v28 = vpack.c.bf16 %v2761_v25, %v2761_v25  ;;  %v1822_v20 = vsel %vm574_vm4, %v2761_v25, 0.0 }
 0x37b   : > { %v1913_v4 = vsel %vm634_vm13, %v1820_v28, 0 }
 0x37c   : > { %v1795_v31 = vpop.f32.mrf.mxu2  ;;  %1925 = vmatpush.bf16.msrb.mxu2 %v1913_v4 }
 0x37d   : > { %v1806_v33 = vpop.f32.mrf.mxu3 }
 0x37e   : > { %v1811_v35 = vadd.f32 %v1806_v33, %v1743_v30 }
 0x37f   : > { %v1740_v36 = vpop.f32.mrf.mxu1  ;;  %2254 = vmatmul.msk.bf16.vlgmr.msrb.gmra.mxu2 %vm630_vm14, %v1902_v32 }
 0x380   : > { %v2770_v37 = vadd.f32 %v1816_v22, %v1811_v35 }
 0x382   : > { %v1823_v19 = vsel %vm574_vm4, %v2770_v37, 0.0  ;;  %v1821_v38 = vpack.c.bf16 %v2770_v37, %v2770_v37 }
 0x383   : > { %v1824_v42 = vadd.f32 %v1823_v19, %v1822_v20  ;;  %v1860_v20 = vld [vmem:[%s2838_s8] sm:$0xf] }
 0x384   : > { %v1916_v43 = vsel %vm634_vm13, %v1821_v38, 0 }
 0x385   : > { %v1808_v29 = vpop.f32.mrf.mxu3  ;;  %1825 = vadd.xlane.f32.xlu0 %v1824_v42  ;;  %1938 = vmatpush.bf16.msrb.mxu3 %v1916_v43 }
 0x388   : > { %2255 = vmatmul.msk.bf16.vlgmr.msrb.gmra.mxu3 %vm630_vm14, %v1902_v32 }
 0x3f8   : > { %v1826_v49 = vpop.xlane.xlu0 %1825 }
 0x3f9   : > { %v1834_v34 = vmul.f32 %v1833_v41, %v1826_v49 }
 0x3fb   : > { %v1836_v50 = vpack.c.bf16 %v1834_v34, %v1834_v34 }
 0x3fd   : > { %v1842_v51 = vsel %vm634_vm13, %v1836_v50, 0 }
 0x3fe   : > { %1851 = vmatpush.bf16.msrb.mxu0 %v1842_v51 }
 0x401   : > { %2251 = vmatmul.msk.bf16.vlgmr.msrb.gmra.mxu0 %vm630_vm14, %v1835_v53 }
 0x402   : > { %v1927_v55 = vpop.f32.mrf.mxu2 }
 0x403   : > { %v1928_v52 = vadd.f32 %v1927_v55, %v1907_v54 }
 0x405   : > { %v1944_v56 = vmax.f32 %v1928_v52, 0.0 }
 0x407   : > { %v1947_v57 = vpack.c.bf16 %v1944_v56, %v1944_v56 }
 0x409   : > { %v1960_v58 = vsel %vm574_vm4, %v1947_v57, 0 }
 0x40a   : > { %1972 = vmatpush.bf16.msra.mxu0 %v1960_v58  ;;  %v1929_v59 = vpop.f32.mrf.mxu2 }
 0x40b   : > { %v1940_v0 = vpop.f32.mrf.mxu3 }
 0x40c   : > { %v1941_v61 = vadd.f32 %v1940_v0, %v1907_v54 }
 0x40e   : > { %v1945_v2 = vmax.f32 %v1941_v61, 0.0 }
 0x410   : > { %v1948_v9 = vpack.c.bf16 %v1945_v2, %v1945_v2 }
 0x411   : > { %2256 = vmatmul.msk.bf16.vlgmr.msra.gmra.mxu0 %vm1955_vm1, %v1946_v63 }
 0x412   : > { %v1963_v13 = vsel %vm574_vm4, %v1948_v9, 0 }
 0x413   : > { %v1942_v1 = vpop.f32.mrf.mxu3 }
 0x47e   : > { %v1853_v3 = vpop.f32.mrf.mxu0 }
 0x47f   : > { %v1854_v6 = vadd.f32 %v1853_v3, %v1837_v62 }
 0x481   : > { %v1857_v7 = vmax.f32 %v1854_v6, 0.0 }
 0x483   : > { %v1859_v11 = vpack.c.bf16 %v1857_v7, %v1857_v7 }
 0x485   : > { %v1868_v12 = vand.u32 %v1866_v10, %v1859_v11  ;;  %v2043_v11 = vld [vmem:[%s2844_s14] sm:$0x3] }
 0x486   : > { %v1855_v14 = vpop.f32.mrf.mxu0 }
 0x487   : > { %1877 = vmatpush.bf16.msrb.mxu1 %v1868_v12  ;;  %v2029_v12 = vmul.f32 %v2761_v25, %v2761_v25 }
 0x48a   : > { %2252 = vmatmul.msk.bf16.vlgmr.msrb.gmra.mxu1 %vm830_vm9, %v1858_v16 }
 0x48b   : > { %1985 = vmatpush.bf16.msra.mxu1 %v1963_v13  ;;  %v2030_v13 = vmul.f32 %v2770_v37, %v2770_v37 }
 0x48e   : > { %v1974_v17 = vpop.f32.mrf.mxu0 }
 0x48f   : > { %v1975_v39 = vadd.f32 %v1974_v17, %v1953_v8 }
 0x491   : > { %v2258_v18 = vmul.f32 -1.442695, %v1975_v39 }
 0x493   : > { %2292 = vpow2.f32 %v2258_v18 }
 0x496   : > { %v1976_v5 = vpop.f32.mrf.mxu0 }
 0x499   : > { %v2293_v60 = vpop.eup %2292 }
 0x49a   : > { %v1997_v21 = vadd.f32 1.0, %v2293_v60  ;;  %2257 = vmatmul.msk.bf16.vlgmr.msra.gmra.mxu1 %vm1955_vm1, %v1946_v63  ;;  %v2040_v60 = vld [vmem:[%s2843_s13] sm:$0x3] }
 0x49c   : > { %2294 = vrcp.f32 %v1997_v21  ;;  %v2010_v27 = vand.u32 2147483648, %v1997_v21  ;;  %v2008_v40 = vand.u32 2147483647, %v1997_v21  ;;  %vm2004_vm5 = vweird.f32 %v1997_v21 }
 0x49e   : > { %v2011_v30 = vor.u32 1.1754944e-38, %v2010_v27  ;;  %vm2009_vm7 = vcmp.eq.f32.partialorder %v2008_v40, 8.507059e+37  ;;  %v2120_v40 = vpop.permute.xlu2 %2119 }
 0x4a2   : > { %v2295_v22 = vpop.eup %2294 }
 0x4a3   : > { %v2000_v23 = vmul.f32 %v2295_v22, %v1997_v21  ;;  %vm2005_vm3 = vweird.f32 %v2295_v22 }
 0x4a4   : > { %vm2006_vm6 = vmor %vm2004_vm5, %vm2005_vm3 }
 0x4a5   : > { %v2001_v26 = vsub.f32 1.0, %v2000_v23 }
 0x4a7   : > { %v2002_v28 = vmul.f32 %v2295_v22, %v2001_v26 }
 0x4a9   : > { %v2003_v4 = vadd.f32 %v2295_v22, %v2002_v28 }
 0x4ab   : > { %v2007_v31 = vsel %vm2006_vm6, %v2295_v22, %v2003_v4 }
 0x4ac   : > { %v2012_v32 = vsel %vm2009_vm7, %v2011_v30, %v2007_v31 }
 0x4ad   : > { %v2038_v33 = vmul.f32 %v2012_v32, %v2761_v25 }
 0x4af   : > { %v2044_v35 = vpack.c.bf16 %v2038_v33, %v2038_v33 }
 0x4b1   : > { %v2050_v36 = vsel %vm634_vm13, %v2044_v35, 0 }
 0x4b2   : > { %2062 = vmatpush.bf16.msra.mxu2 %v2050_v36 }
 0x4b5   : > { %2260 = vmatmul.msk.bf16.vlgmr.msra.gmra.mxu2 %vm630_vm14, %v2043_v11 }
 0x507   : > { %v1879_v19 = vpop.f32.mrf.mxu1 }
 0x508   : > { %v1880_v38 = vadd.f32 %v1879_v19, %v1860_v20 }
 0x50a   : > { %v2253_v42 = vmul.f32 -1.442695, %v1880_v38 }
 0x50c   : > { %2296 = vpow2.f32 %v2253_v42 }
 0x50f   : > { %v1881_v43 = vpop.f32.mrf.mxu1 }
 0x512   : > { %v2297_v29 = vpop.eup %2296 }
 0x513   : > { %v1886_v44 = vadd.f32 1.0, %v2297_v29 }
 0x515   : > { %2298 = vrcp.f32 %v1886_v44  ;;  %v1898_v49 = vand.u32 2147483648, %v1886_v44  ;;  %v1896_v51 = vand.u32 2147483647, %v1886_v44  ;;  %vm1892_vm9 = vweird.f32 %v1886_v44 }
 0x517   : > { %v1987_v24 = vpop.f32.mrf.mxu1  ;;  %v1899_v52 = vor.u32 1.1754944e-38, %v1898_v49  ;;  %vm1897_vm11 = vcmp.eq.f32.partialorder %v1896_v51, 8.507059e+37 }
 0x518   : > { %v1988_v45 = vadd.f32 %v1987_v24, %v1953_v8 }
 0x51a   : > { %v2259_v46 = vmul.f32 -1.442695, %v1988_v45 }
 0x51b   : > { %v2299_v47 = vpop.eup %2298 }
 0x51c   : > { %2300 = vpow2.f32 %v2259_v46  ;;  %v1888_v48 = vmul.f32 %v2299_v47, %v1886_v44  ;;  %vm1893_vm8 = vweird.f32 %v2299_v47 }
 0x51d   : > { %vm1894_vm10 = vmor %vm1892_vm9, %vm1893_vm8 }
 0x51e   : > { %v1889_v41 = vsub.f32 1.0, %v1888_v48 }
 0x51f   : > { %v1989_v34 = vpop.f32.mrf.mxu1 }
 0x520   : > { %v1890_v50 = vmul.f32 %v2299_v47, %v1889_v41 }
 0x522   : > { %v2301_v53 = vpop.eup %2300  ;;  %v1891_v54 = vadd.f32 %v2299_v47, %v1890_v50 }
 0x523   : > { %v1998_v55 = vadd.f32 1.0, %v2301_v53 }
 0x524   : > { %v1895_v56 = vsel %vm1894_vm10, %v2299_v47, %v1891_v54 }
 0x525   : > { %2302 = vrcp.f32 %v1998_v55  ;;  %v1900_v57 = vsel %vm1897_vm11, %v1899_v52, %v1895_v56  ;;  %v2025_v0 = vand.u32 2147483648, %v1998_v55  ;;  %v2023_v61 = vand.u32 2147483647, %v1998_v55 }
 0x526   : > { %2033 = vperm.xlu1 %2289, %v1900_v57   ;;  %vm2019_vm15 = vweird.f32 %v1998_v55 }
 0x527   : > { %v2026_v2 = vor.u32 1.1754944e-38, %v2025_v0  ;;  %vm2024_vm1 = vcmp.eq.f32.partialorder %v2023_v61, 8.507059e+37 }
 0x52b   : > { %v2303_v58 = vpop.eup %2302 }
 0x52c   : > { %v2015_v59 = vmul.f32 %v2303_v58, %v1998_v55  ;;  %vm2020_vm12 = vweird.f32 %v2303_v58 }
 0x52d   : > { %vm2021_vm0 = vmor %vm2019_vm15, %vm2020_vm12 }
 0x52e   : > { %v2016_v63 = vsub.f32 1.0, %v2015_v59 }
 0x530   : > { %v2017_v1 = vmul.f32 %v2303_v58, %v2016_v63 }
 0x532   : > { %v2018_v62 = vadd.f32 %v2303_v58, %v2017_v1 }
 0x534   : > { %v2022_v3 = vsel %vm2021_vm0, %v2303_v58, %v2018_v62 }
 0x535   : > { %v2027_v6 = vsel %vm2024_vm1, %v2026_v2, %v2022_v3 }
 0x536   : > { %v2039_v7 = vmul.f32 %v2027_v6, %v2770_v37 }
 0x538   : > { %v2045_v9 = vpack.c.bf16 %v2039_v7, %v2039_v7  ;;  %v2064_v25 = vpop.f32.mrf.mxu2 }
 0x53a   : > { %v2053_v10 = vsel %vm634_vm13, %v2045_v9, 0 }
 0x53b   : > { %2075 = vmatpush.bf16.msra.mxu3 %v2053_v10 }
 0x53e   : > { %2261 = vmatmul.msk.bf16.vlgmr.msra.gmra.mxu3 %vm630_vm14, %v2043_v11 }
 0x540   : > { %v2066_v22 = vpop.f32.mrf.mxu2 }
 0x598   : > { %v2034_v14 = vpop.permute.xlu1 %2033 }
 0x599   : > { %v2036_v16 = vmul.f32 %v2034_v14, %v2029_v12  ;;  %v2037_v8 = vmul.f32 %v2034_v14, %v2030_v13 }
 0x59b   : > { %v2041_v17 = vpack.c.bf16 %v2036_v16, %v2036_v16  ;;  %v2042_v39 = vpack.c.bf16 %v2037_v8, %v2037_v8 }
 0x59d   : > { %v2085_v18 = vsel %vm634_vm13, %v2041_v17, 0  ;;  %v2088_v5 = vsel %vm634_vm13, %v2042_v39, 0 }
 0x59e   : > { %2097 = vmatpush.bf16.msrb.mxu0 %v2085_v18  ;;  %2110 = vmatpush.bf16.msrb.mxu1 %v2088_v5 }
 0x5a1   : > { %2262 = vmatmul.msk.bf16.vlgmr.msrb.gmra.mxu0 %vm630_vm14, %v2040_v60  ;;  %2263 = vmatmul.msk.bf16.vlgmr.msrb.gmra.mxu1 %vm630_vm14, %v2040_v60 }
 0x5c1   : > { %v2077_v37 = vpop.f32.mrf.mxu3 }
 0x5c9   : > { %v2079_v21 = vpop.f32.mrf.mxu3 }
 0x61e   : > { %v2099_v23 = vpop.f32.mrf.mxu0  ;;  %v2112_v26 = vpop.f32.mrf.mxu1 }
 0x61f   : > { %v2100_v27 = vadd.f32 %v2099_v23, %v2064_v25  ;;  %v2113_v28 = vadd.f32 %v2112_v26, %v2077_v37 }
 0x621   : > { %v2123_v4 = vadd.f32 %v2120_v40, %v2113_v28  ;;  %v2122_v30 = vadd.f32 %v2120_v40, %v2100_v27 }
 0x623   : > { %v2126_v31 = vrot.slane %v2123_v4, 4 }
 0x625   : > { %v2127_v32 = vsel %vm574_vm4, %v2122_v30, %v2126_v31 }
 0x626   : > { %v2129_v33 = vadd.f32 %v2127_v32, %v2442_v15  ;;  %v2114_v35 = vpop.f32.mrf.mxu1  ;;  %v2101_v36 = vpop.f32.mrf.mxu0 }
 0x628   : > { %2130 = vst [vmem:[%s523_s26] sm:$0xff] %v2129_v33 }
 0x629 PF: > { %s28_s23 = sadd.s32 1, %s2310_s23  }
 0x62a   : > { %p25_p4 = scmp.ge.s32.totalorder %s28_s23, 4  }
 0x62c   :  { %27 = sbr.rel (!%p25_p4) target bundleno = 3 (0x3), region = 146 }

</bundles_post_ra>
